<compile_context>
chip_gen: v5e
topology: v5e:2x2
jax: 0.10.0
libtpu: 0.0.40
codegen_flags: <defaults>
</compile_context>

<pallas_src>
import functools

import jax
import jax.numpy as jnp
from jax import lax
from jax.experimental import pallas as pl
from jax.experimental.pallas import tpu as pltpu


def _round_up(x, m):
    return ((x + m - 1) // m) * m


# ----------------------------------------------------------------------------
# Fused kernel: in-VMEM im2col + conv stem matmul + cls head + seg head.
# Single grid step; batch folded into the lane (column) axis.
# ----------------------------------------------------------------------------
def fused_model_kernel(x_ref, wc_ref, bc_ref, wfc_ref, bfc_ref, wseg_ref,
                       bseg_ref, cls_ref, seg_ref, *, B, H, W, Lp, Cpad):
    # x_ref:    (Cpad, B*Lp)  guarded, channel-padded, flattened images (f32)
    # wc_ref:   (Cout, 9*Cpad) conv weights, row order (kh, kw, c) (bf16)
    # bc_ref:   (Cout, 1)     conv bias (f32)
    # wfc_ref:  (Cout, NCP)   FC weights, lane-padded to 128 (f32)
    # bfc_ref:  (1, NCP)      FC bias (f32)
    # wseg_ref: (Cout, 1)     1x1-conv seg weights (f32)
    # bseg_ref: (1, 1)        seg bias (f32)
    # cls_ref:  (B, NCP)      lane-dense cls block
    # seg_ref:  (B, HW)       lane-dense seg slab
    HW = H * W
    BHW = B * HW
    N = B * Lp

    X = x_ref[...]                                          # (Cpad, N) f32

    # Roll-direction guard: pltpu.roll is expected to match np.roll, but the
    # rotate convention is verified at runtime with a 1-vreg iota probe and
    # the correct direction is selected.  Costs a few extra XLU rotations on
    # an otherwise idle unit; removes any dependence on the convention.
    probe = lax.broadcasted_iota(jnp.int32, (1, N), 1)
    probe_r = pltpu.roll(probe, N - 1, axis=1)
    roll_is_np = probe_r[0:1, 0:1] < jnp.int32(N // 2)      # (1, 1) bool

    # Column-within-row index of each output pixel (same for every image
    # because HW is a multiple of W).  Used to zero the two horizontal taps
    # that read across a row boundary.
    col = lax.broadcasted_iota(jnp.int32, (1, BHW), 1) % W

    # In-VMEM im2col: tap (kh, kw) of output pixel p is X[:, p + S] with
    # S = (kh+1)*W + kw - 1 thanks to the 2 guard rows per image side.
    taps = []
    for kh in range(3):
        for kw in range(3):
            S = (kh + 1) * W + (kw - 1)
            r_np = pltpu.roll(X, N - S, axis=1)     # np.roll: r[j] = X[j + S]
            r_alt = pltpu.roll(X, S, axis=1)        # opposite convention
            Xr = jnp.where(roll_is_np, r_np, r_alt)
            # Per-image aligned lane slices (Lp and HW are multiples of 128).
            t = jnp.concatenate(
                [Xr[:, b * Lp:b * Lp + HW] for b in range(B)], axis=1)
            if kw == 0:                              # reads previous row's end
                t = jnp.where(col == 0, 0.0, t)
            elif kw == 2:                            # reads next row's start
                t = jnp.where(col == W - 1, 0.0, t)
            taps.append(t)                           # (Cpad, BHW) f32

    # (9*Cpad, BHW): every piece is 8 sublane rows -> aligned concat.
    patches = jnp.concatenate(taps, axis=0).astype(jnp.bfloat16)

    # Conv stem: one (Cout, 9*Cpad) @ (9*Cpad, B*HW) matmul, f32 accumulation.
    feat = jnp.dot(wc_ref[...], patches, preferred_element_type=jnp.float32)
    feat = jnp.maximum(feat + bc_ref[...], 0.0)              # (Cout, BHW) f32

    # Seg head (1x1 conv): VPU broadcast-mul + sublane reduce in f32 (no MXU
    # M=1 pass, no bf16 cast of the feature map).
    seg = jnp.sum(feat * wseg_ref[...], axis=0, keepdims=True) + bseg_ref[...]
    seg_ref[...] = jnp.concatenate(
        [seg[:, b * HW:(b + 1) * HW] for b in range(B)], axis=0)   # (B, HW)

    # Cls head: per-image global average pool (XLU lane reduce) + tiny FC as
    # broadcast-mul + sublane reduce (MXU-free).
    inv_hw = jnp.float32(1.0 / HW)
    rows = []
    for b in range(B):
        pooled = jnp.sum(feat[:, b * HW:(b + 1) * HW], axis=1,
                         keepdims=True) * inv_hw                   # (Cout, 1)
        rows.append(jnp.sum(pooled * wfc_ref[...], axis=0, keepdims=True))
    cls_ref[...] = jnp.concatenate(rows, axis=0) + bfc_ref[...]    # (B, NCP)


# ----------------------------------------------------------------------------
# Wrapper
# ----------------------------------------------------------------------------
def model_forward(img_nchw, params):
    """img_nchw: (B, Cin, H, W) float32.  Returns (cls, seg) like Model.forward:
    cls (B, num_classes), seg (B, 1, H, W)."""
    w_conv, b_conv, w_fc, b_fc, w_seg, b_seg = params
    B, Cin, H, W = img_nchw.shape
    Cout = w_conv.shape[0]
    NC = w_fc.shape[1]
    HW = H * W

    G = 2                                   # zero guard rows per image side
    Cpad = _round_up(max(Cin, 1), 8)        # aligned 8-row tap blocks
    Lr = (H + 2 * G) * W                    # flattened guarded image length
    Lp = _round_up(Lr, 128)                 # lane-aligned per-image stride
    Kp = 9 * Cpad
    NCP = _round_up(max(NC, 1), 128)        # lane-dense cls block

    # Guarded, channel-padded, flattened images: (Cpad, B*Lp).  1x image
    # bytes of HBM traffic (no patch inflation, no pre-kernel concat pass).
    xg = jnp.pad(img_nchw, ((0, 0), (0, Cpad - Cin), (G, G), (0, 0)))
    xg = xg.reshape(B, Cpad, Lr)
    xg = jnp.pad(xg, ((0, 0), (0, 0), (0, Lp - Lr)))
    x_flat = jnp.transpose(xg, (1, 0, 2)).reshape(Cpad, B * Lp)

    # Conv weight (Cout, Cin, 3, 3) -> (Cout, 9*Cpad), row order (kh, kw, c);
    # padded channels carry zero weight.
    wc = jnp.pad(w_conv, ((0, 0), (0, Cpad - Cin), (0, 0), (0, 0)))
    wc = jnp.transpose(wc, (0, 2, 3, 1)).reshape(Cout, Kp).astype(jnp.bfloat16)

    bc = b_conv.reshape(Cout, 1).astype(jnp.float32)
    wfc = jnp.pad(w_fc, ((0, 0), (0, NCP - NC))).astype(jnp.float32)
    bfc = jnp.pad(b_fc.reshape(1, NC), ((0, 0), (0, NCP - NC))).astype(jnp.float32)
    wseg = w_seg.reshape(Cout, 1).astype(jnp.float32)
    bseg = b_seg.reshape(1, 1).astype(jnp.float32)

    kernel = functools.partial(fused_model_kernel, B=B, H=H, W=W, Lp=Lp,
                               Cpad=Cpad)

    cls_p, seg_flat = pl.pallas_call(
        kernel,
        out_shape=(
            jax.ShapeDtypeStruct((B, NCP), jnp.float32),
            jax.ShapeDtypeStruct((B, HW), jnp.float32),
        ),
        grid_spec=pltpu.PrefetchScalarGridSpec(
            num_scalar_prefetch=0,
            grid=(1,),
            in_specs=[
                pl.BlockSpec((Cpad, B * Lp), lambda i: (0, 0)),
                pl.BlockSpec((Cout, Kp), lambda i: (0, 0)),
                pl.BlockSpec((Cout, 1), lambda i: (0, 0)),
                pl.BlockSpec((Cout, NCP), lambda i: (0, 0)),
                pl.BlockSpec((1, NCP), lambda i: (0, 0)),
                pl.BlockSpec((Cout, 1), lambda i: (0, 0)),
                pl.BlockSpec((1, 1), lambda i: (0, 0)),
            ],
            out_specs=[
                pl.BlockSpec((B, NCP), lambda i: (0, 0)),
                pl.BlockSpec((B, HW), lambda i: (0, 0)),
            ],
        ),
        compiler_params=pltpu.CompilerParams(
            dimension_semantics=("arbitrary",)),
    )(x_flat, wc, bc, wfc, bfc, wseg, bseg)

    cls = cls_p[:, :NC]                       # drop lane padding (free slice)
    seg = seg_flat.reshape(B, 1, H, W)        # free reshape of lane-dense slab
    return cls, seg


def init_params(key, cin=3, cout=32, num_classes=4):
    k = jax.random.split(key, 4)
    w_conv = 0.05 * jax.random.normal(k[0], (cout, cin, 3, 3), jnp.float32)
    b_conv = 0.02 * jax.random.normal(k[1], (cout,), jnp.float32)
    w_fc = 0.05 * jax.random.normal(k[2], (cout, num_classes), jnp.float32)
    b_fc = jnp.zeros((num_classes,), jnp.float32)
    w_seg = 0.05 * jax.random.normal(k[3], (cout,), jnp.float32)
    b_seg = jnp.zeros((1,), jnp.float32)
    return (w_conv, b_conv, w_fc, b_fc, w_seg, b_seg)


def _reference_forward(img_nchw, params):
    """Pure-JAX f32 reference with identical semantics (sanity check)."""
    w_conv, b_conv, w_fc, b_fc, w_seg, b_seg = params
    feat = lax.conv_general_dilated(
        img_nchw, w_conv, window_strides=(1, 1), padding='SAME',
        dimension_numbers=('NCHW', 'OIHW', 'NCHW'))
    feat = jnp.maximum(feat + b_conv[None, :, None, None], 0.0)
    seg = jnp.einsum('c,bchw->bhw', w_seg, feat)[:, None] + b_seg[0]
    pooled = feat.mean(axis=(2, 3))
    cls = pooled @ w_fc + b_fc[None, :]
    return cls, seg


if __name__ == "__main__":
    key = jax.random.PRNGKey(0)
    k_img, k_par = jax.random.split(key)

    B, Cin, H, W = 2, 3, 16, 16
    num_classes = 4
    img = jax.random.normal(k_img, (B, Cin, H, W), jnp.float32)
    params = init_params(k_par, cin=Cin, cout=32, num_classes=num_classes)

    cls, seg = jax.jit(model_forward)(img, params)
    jax.block_until_ready((cls, seg))

    assert cls.shape == (B, num_classes), cls.shape
    assert seg.shape == (B, 1, H, W), seg.shape

    cls_ref, seg_ref = _reference_forward(img, params)
    # bf16 matmul operands (f32 accumulation) => loose-ish tolerance.
    assert bool(jnp.allclose(cls, cls_ref, atol=2e-2, rtol=2e-2)), (
        float(jnp.max(jnp.abs(cls - cls_ref))))
    assert bool(jnp.allclose(seg, seg_ref, atol=2e-2, rtol=2e-2)), (
        float(jnp.max(jnp.abs(seg - seg_ref))))

    print("KERNEL_OK")
</pallas_src>

<mosaic_0001>
module attributes {stable_mosaic.version = 11 : i64} {
  func.func @fused_model_kernel(%arg0: i32, %arg1: memref<8x768xf32, #tpu.memory_space<vmem>>, %arg2: memref<32x72xbf16, #tpu.memory_space<vmem>>, %arg3: memref<32x1xf32, #tpu.memory_space<vmem>>, %arg4: memref<32x128xf32, #tpu.memory_space<vmem>>, %arg5: memref<1x128xf32, #tpu.memory_space<vmem>>, %arg6: memref<32x1xf32, #tpu.memory_space<vmem>>, %arg7: memref<1x1xf32, #tpu.memory_space<vmem>>, %arg8: memref<2x128xf32, #tpu.memory_space<vmem>>, %arg9: memref<2x256xf32, #tpu.memory_space<vmem>>) attributes {dimension_semantics = [#tpu.dimension_semantics<arbitrary>], iteration_bounds = array<i64: 1>, scalar_prefetch = 0 : i64, scratch_operands = 0 : i64, tpu.core_type = #tpu.core_type<tc>, window_params = [{pipeline_mode = #tpu.pipeline_mode<synchronous>, transform_indices = @transform_0, window_bounds = array<i64: 8, 768>}, {pipeline_mode = #tpu.pipeline_mode<synchronous>, transform_indices = @transform_1, window_bounds = array<i64: 32, 72>}, {pipeline_mode = #tpu.pipeline_mode<synchronous>, transform_indices = @transform_2, window_bounds = array<i64: 32, 1>}, {pipeline_mode = #tpu.pipeline_mode<synchronous>, transform_indices = @transform_3, window_bounds = array<i64: 32, 128>}, {pipeline_mode = #tpu.pipeline_mode<synchronous>, transform_indices = @transform_4, window_bounds = array<i64: 1, 128>}, {pipeline_mode = #tpu.pipeline_mode<synchronous>, transform_indices = @transform_5, window_bounds = array<i64: 32, 1>}, {pipeline_mode = #tpu.pipeline_mode<synchronous>, transform_indices = @transform_6, window_bounds = array<i64: 1, 1>}, {pipeline_mode = #tpu.pipeline_mode<synchronous>, transform_indices = @transform_7, window_bounds = array<i64: 2, 128>}, {pipeline_mode = #tpu.pipeline_mode<synchronous>, transform_indices = @transform_8, window_bounds = array<i64: 2, 256>}]} {
    %c0 = arith.constant 0 : index
    %c0_0 = arith.constant 0 : index
    %0 = vector.load %arg1[%c0, %c0_0] : memref<8x768xf32, #tpu.memory_space<vmem>>, vector<8x768xf32>
    %1 = tpu.iota {dimensions = array<i32: 1>} : vector<1x768xi32>
    %c767_i32 = arith.constant 767 : i32
    %2 = tpu.dynamic_rotate %1 by %c767_i32 dim 1 : vector<1x768xi32>, i32 -> vector<1x768xi32>
    %3 = vector.extract_strided_slice %2 {offsets = [0, 0], sizes = [1, 1], strides = [1, 1]} : vector<1x768xi32> to vector<1x1xi32>
    %c384_i32 = arith.constant 384 : i32
    %4 = vector.broadcast %c384_i32 : i32 to vector<1x1xi32>
    %5 = arith.cmpi slt, %3, %4 : vector<1x1xi32>
    %6 = tpu.iota {dimensions = array<i32: 1>} : vector<1x512xi32>
    %c16_i32 = arith.constant 16 : i32
    %c0_i32 = arith.constant 0 : i32
    %7 = arith.cmpi eq, %c16_i32, %c0_i32 : i32
    %c1_i32 = arith.constant 1 : i32
    %8 = arith.select %7, %c1_i32, %c16_i32 : i32
    %9 = vector.broadcast %8 : i32 to vector<1x512xi32>
    %10 = arith.remsi %6, %9 : vector<1x512xi32>
    %c0_i32_1 = arith.constant 0 : i32
    %11 = vector.broadcast %c0_i32_1 : i32 to vector<1x512xi32>
    %12 = arith.cmpi ne, %10, %11 : vector<1x512xi32>
    %c0_i32_2 = arith.constant 0 : i32
    %13 = vector.broadcast %c0_i32_2 : i32 to vector<1x512xi32>
    %14 = arith.cmpi slt, %10, %13 : vector<1x512xi32>
    %c0_i32_3 = arith.constant 0 : i32
    %15 = arith.cmpi slt, %8, %c0_i32_3 : i32
    %16 = vector.broadcast %15 : i1 to vector<1x512xi1>
    %17 = vector.broadcast %16 : vector<1x512xi1> to vector<1x512xi1>
    %18 = arith.xori %14, %17 : vector<1x512xi1>
    %19 = arith.andi %18, %12 : vector<1x512xi1>
    %20 = vector.broadcast %8 : i32 to vector<1x512xi32>
    %21 = arith.addi %10, %20 : vector<1x512xi32>
    %22 = arith.select %19, %21, %10 : vector<1x512xi1>, vector<1x512xi32>
    %c753_i32 = arith.constant 753 : i32
    %23 = tpu.dynamic_rotate %0 by %c753_i32 dim 1 : vector<8x768xf32>, i32 -> vector<8x768xf32>
    %c15_i32 = arith.constant 15 : i32
    %24 = tpu.dynamic_rotate %0 by %c15_i32 dim 1 : vector<8x768xf32>, i32 -> vector<8x768xf32>
    %25 = vector.shape_cast %5 : vector<1x1xi1> to vector<1x1xi1>
    %26 = vector.broadcast %25 : vector<1x1xi1> to vector<8x768xi1>
    %27 = arith.select %26, %23, %24 : vector<8x768xi1>, vector<8x768xf32>
    %28 = vector.extract_strided_slice %27 {offsets = [0, 0], sizes = [8, 256], strides = [1, 1]} : vector<8x768xf32> to vector<8x256xf32>
    %29 = vector.extract_strided_slice %27 {offsets = [0, 384], sizes = [8, 256], strides = [1, 1]} : vector<8x768xf32> to vector<8x256xf32>
    %30 = tpu.concatenate %28, %29 in 1 : vector<8x256xf32>, vector<8x256xf32> -> vector<8x512xf32>
    %c0_i32_4 = arith.constant 0 : i32
    %31 = vector.broadcast %c0_i32_4 : i32 to vector<1x512xi32>
    %32 = arith.cmpi eq, %22, %31 : vector<1x512xi32>
    %cst = arith.constant 0.000000e+00 : f32
    %33 = vector.shape_cast %32 : vector<1x512xi1> to vector<1x512xi1>
    %34 = vector.broadcast %33 : vector<1x512xi1> to vector<8x512xi1>
    %35 = vector.broadcast %cst : f32 to vector<8x512xf32>
    %36 = arith.select %34, %35, %30 : vector<8x512xi1>, vector<8x512xf32>
    %c752_i32 = arith.constant 752 : i32
    %37 = tpu.dynamic_rotate %0 by %c752_i32 dim 1 : vector<8x768xf32>, i32 -> vector<8x768xf32>
    %c16_i32_5 = arith.constant 16 : i32
    %38 = tpu.dynamic_rotate %0 by %c16_i32_5 dim 1 : vector<8x768xf32>, i32 -> vector<8x768xf32>
    %39 = vector.shape_cast %5 : vector<1x1xi1> to vector<1x1xi1>
    %40 = vector.broadcast %39 : vector<1x1xi1> to vector<8x768xi1>
    %41 = arith.select %40, %37, %38 : vector<8x768xi1>, vector<8x768xf32>
    %42 = vector.extract_strided_slice %41 {offsets = [0, 0], sizes = [8, 256], strides = [1, 1]} : vector<8x768xf32> to vector<8x256xf32>
    %43 = vector.extract_strided_slice %41 {offsets = [0, 384], sizes = [8, 256], strides = [1, 1]} : vector<8x768xf32> to vector<8x256xf32>
    %44 = tpu.concatenate %42, %43 in 1 : vector<8x256xf32>, vector<8x256xf32> -> vector<8x512xf32>
    %c751_i32 = arith.constant 751 : i32
    %45 = tpu.dynamic_rotate %0 by %c751_i32 dim 1 : vector<8x768xf32>, i32 -> vector<8x768xf32>
    %c17_i32 = arith.constant 17 : i32
    %46 = tpu.dynamic_rotate %0 by %c17_i32 dim 1 : vector<8x768xf32>, i32 -> vector<8x768xf32>
    %47 = vector.shape_cast %5 : vector<1x1xi1> to vector<1x1xi1>
    %48 = vector.broadcast %47 : vector<1x1xi1> to vector<8x768xi1>
    %49 = arith.select %48, %45, %46 : vector<8x768xi1>, vector<8x768xf32>
    %50 = vector.extract_strided_slice %49 {offsets = [0, 0], sizes = [8, 256], strides = [1, 1]} : vector<8x768xf32> to vector<8x256xf32>
    %51 = vector.extract_strided_slice %49 {offsets = [0, 384], sizes = [8, 256], strides = [1, 1]} : vector<8x768xf32> to vector<8x256xf32>
    %52 = tpu.concatenate %50, %51 in 1 : vector<8x256xf32>, vector<8x256xf32> -> vector<8x512xf32>
    %c15_i32_6 = arith.constant 15 : i32
    %53 = vector.broadcast %c15_i32_6 : i32 to vector<1x512xi32>
    %54 = arith.cmpi eq, %22, %53 : vector<1x512xi32>
    %cst_7 = arith.constant 0.000000e+00 : f32
    %55 = vector.shape_cast %54 : vector<1x512xi1> to vector<1x512xi1>
    %56 = vector.broadcast %55 : vector<1x512xi1> to vector<8x512xi1>
    %57 = vector.broadcast %cst_7 : f32 to vector<8x512xf32>
    %58 = arith.select %56, %57, %52 : vector<8x512xi1>, vector<8x512xf32>
    %c737_i32 = arith.constant 737 : i32
    %59 = tpu.dynamic_rotate %0 by %c737_i32 dim 1 : vector<8x768xf32>, i32 -> vector<8x768xf32>
    %c31_i32 = arith.constant 31 : i32
    %60 = tpu.dynamic_rotate %0 by %c31_i32 dim 1 : vector<8x768xf32>, i32 -> vector<8x768xf32>
    %61 = vector.shape_cast %5 : vector<1x1xi1> to vector<1x1xi1>
    %62 = vector.broadcast %61 : vector<1x1xi1> to vector<8x768xi1>
    %63 = arith.select %62, %59, %60 : vector<8x768xi1>, vector<8x768xf32>
    %64 = vector.extract_strided_slice %63 {offsets = [0, 0], sizes = [8, 256], strides = [1, 1]} : vector<8x768xf32> to vector<8x256xf32>
    %65 = vector.extract_strided_slice %63 {offsets = [0, 384], sizes = [8, 256], strides = [1, 1]} : vector<8x768xf32> to vector<8x256xf32>
    %66 = tpu.concatenate %64, %65 in 1 : vector<8x256xf32>, vector<8x256xf32> -> vector<8x512xf32>
    %c0_i32_8 = arith.constant 0 : i32
    %67 = vector.broadcast %c0_i32_8 : i32 to vector<1x512xi32>
    %68 = arith.cmpi eq, %22, %67 : vector<1x512xi32>
    %cst_9 = arith.constant 0.000000e+00 : f32
    %69 = vector.shape_cast %68 : vector<1x512xi1> to vector<1x512xi1>
    %70 = vector.broadcast %69 : vector<1x512xi1> to vector<8x512xi1>
    %71 = vector.broadcast %cst_9 : f32 to vector<8x512xf32>
    %72 = arith.select %70, %71, %66 : vector<8x512xi1>, vector<8x512xf32>
    %c736_i32 = arith.constant 736 : i32
    %73 = tpu.dynamic_rotate %0 by %c736_i32 dim 1 : vector<8x768xf32>, i32 -> vector<8x768xf32>
    %c32_i32 = arith.constant 32 : i32
    %74 = tpu.dynamic_rotate %0 by %c32_i32 dim 1 : vector<8x768xf32>, i32 -> vector<8x768xf32>
    %75 = vector.shape_cast %5 : vector<1x1xi1> to vector<1x1xi1>
    %76 = vector.broadcast %75 : vector<1x1xi1> to vector<8x768xi1>
    %77 = arith.select %76, %73, %74 : vector<8x768xi1>, vector<8x768xf32>
    %78 = vector.extract_strided_slice %77 {offsets = [0, 0], sizes = [8, 256], strides = [1, 1]} : vector<8x768xf32> to vector<8x256xf32>
    %79 = vector.extract_strided_slice %77 {offsets = [0, 384], sizes = [8, 256], strides = [1, 1]} : vector<8x768xf32> to vector<8x256xf32>
    %80 = tpu.concatenate %78, %79 in 1 : vector<8x256xf32>, vector<8x256xf32> -> vector<8x512xf32>
    %c735_i32 = arith.constant 735 : i32
    %81 = tpu.dynamic_rotate %0 by %c735_i32 dim 1 : vector<8x768xf32>, i32 -> vector<8x768xf32>
    %c33_i32 = arith.constant 33 : i32
    %82 = tpu.dynamic_rotate %0 by %c33_i32 dim 1 : vector<8x768xf32>, i32 -> vector<8x768xf32>
    %83 = vector.shape_cast %5 : vector<1x1xi1> to vector<1x1xi1>
    %84 = vector.broadcast %83 : vector<1x1xi1> to vector<8x768xi1>
    %85 = arith.select %84, %81, %82 : vector<8x768xi1>, vector<8x768xf32>
    %86 = vector.extract_strided_slice %85 {offsets = [0, 0], sizes = [8, 256], strides = [1, 1]} : vector<8x768xf32> to vector<8x256xf32>
    %87 = vector.extract_strided_slice %85 {offsets = [0, 384], sizes = [8, 256], strides = [1, 1]} : vector<8x768xf32> to vector<8x256xf32>
    %88 = tpu.concatenate %86, %87 in 1 : vector<8x256xf32>, vector<8x256xf32> -> vector<8x512xf32>
    %c15_i32_10 = arith.constant 15 : i32
    %89 = vector.broadcast %c15_i32_10 : i32 to vector<1x512xi32>
    %90 = arith.cmpi eq, %22, %89 : vector<1x512xi32>
    %cst_11 = arith.constant 0.000000e+00 : f32
    %91 = vector.shape_cast %90 : vector<1x512xi1> to vector<1x512xi1>
    %92 = vector.broadcast %91 : vector<1x512xi1> to vector<8x512xi1>
    %93 = vector.broadcast %cst_11 : f32 to vector<8x512xf32>
    %94 = arith.select %92, %93, %88 : vector<8x512xi1>, vector<8x512xf32>
    %c721_i32 = arith.constant 721 : i32
    %95 = tpu.dynamic_rotate %0 by %c721_i32 dim 1 : vector<8x768xf32>, i32 -> vector<8x768xf32>
    %c47_i32 = arith.constant 47 : i32
    %96 = tpu.dynamic_rotate %0 by %c47_i32 dim 1 : vector<8x768xf32>, i32 -> vector<8x768xf32>
    %97 = vector.shape_cast %5 : vector<1x1xi1> to vector<1x1xi1>
    %98 = vector.broadcast %97 : vector<1x1xi1> to vector<8x768xi1>
    %99 = arith.select %98, %95, %96 : vector<8x768xi1>, vector<8x768xf32>
    %100 = vector.extract_strided_slice %99 {offsets = [0, 0], sizes = [8, 256], strides = [1, 1]} : vector<8x768xf32> to vector<8x256xf32>
    %101 = vector.extract_strided_slice %99 {offsets = [0, 384], sizes = [8, 256], strides = [1, 1]} : vector<8x768xf32> to vector<8x256xf32>
    %102 = tpu.concatenate %100, %101 in 1 : vector<8x256xf32>, vector<8x256xf32> -> vector<8x512xf32>
    %c0_i32_12 = arith.constant 0 : i32
    %103 = vector.broadcast %c0_i32_12 : i32 to vector<1x512xi32>
    %104 = arith.cmpi eq, %22, %103 : vector<1x512xi32>
    %cst_13 = arith.constant 0.000000e+00 : f32
    %105 = vector.shape_cast %104 : vector<1x512xi1> to vector<1x512xi1>
    %106 = vector.broadcast %105 : vector<1x512xi1> to vector<8x512xi1>
    %107 = vector.broadcast %cst_13 : f32 to vector<8x512xf32>
    %108 = arith.select %106, %107, %102 : vector<8x512xi1>, vector<8x512xf32>
    %c720_i32 = arith.constant 720 : i32
    %109 = tpu.dynamic_rotate %0 by %c720_i32 dim 1 : vector<8x768xf32>, i32 -> vector<8x768xf32>
    %c48_i32 = arith.constant 48 : i32
    %110 = tpu.dynamic_rotate %0 by %c48_i32 dim 1 : vector<8x768xf32>, i32 -> vector<8x768xf32>
    %111 = vector.shape_cast %5 : vector<1x1xi1> to vector<1x1xi1>
    %112 = vector.broadcast %111 : vector<1x1xi1> to vector<8x768xi1>
    %113 = arith.select %112, %109, %110 : vector<8x768xi1>, vector<8x768xf32>
    %114 = vector.extract_strided_slice %113 {offsets = [0, 0], sizes = [8, 256], strides = [1, 1]} : vector<8x768xf32> to vector<8x256xf32>
    %115 = vector.extract_strided_slice %113 {offsets = [0, 384], sizes = [8, 256], strides = [1, 1]} : vector<8x768xf32> to vector<8x256xf32>
    %116 = tpu.concatenate %114, %115 in 1 : vector<8x256xf32>, vector<8x256xf32> -> vector<8x512xf32>
    %c719_i32 = arith.constant 719 : i32
    %117 = tpu.dynamic_rotate %0 by %c719_i32 dim 1 : vector<8x768xf32>, i32 -> vector<8x768xf32>
    %c49_i32 = arith.constant 49 : i32
    %118 = tpu.dynamic_rotate %0 by %c49_i32 dim 1 : vector<8x768xf32>, i32 -> vector<8x768xf32>
    %119 = vector.shape_cast %5 : vector<1x1xi1> to vector<1x1xi1>
    %120 = vector.broadcast %119 : vector<1x1xi1> to vector<8x768xi1>
    %121 = arith.select %120, %117, %118 : vector<8x768xi1>, vector<8x768xf32>
    %122 = vector.extract_strided_slice %121 {offsets = [0, 0], sizes = [8, 256], strides = [1, 1]} : vector<8x768xf32> to vector<8x256xf32>
    %123 = vector.extract_strided_slice %121 {offsets = [0, 384], sizes = [8, 256], strides = [1, 1]} : vector<8x768xf32> to vector<8x256xf32>
    %124 = tpu.concatenate %122, %123 in 1 : vector<8x256xf32>, vector<8x256xf32> -> vector<8x512xf32>
    %c15_i32_14 = arith.constant 15 : i32
    %125 = vector.broadcast %c15_i32_14 : i32 to vector<1x512xi32>
    %126 = arith.cmpi eq, %22, %125 : vector<1x512xi32>
    %cst_15 = arith.constant 0.000000e+00 : f32
    %127 = vector.shape_cast %126 : vector<1x512xi1> to vector<1x512xi1>
    %128 = vector.broadcast %127 : vector<1x512xi1> to vector<8x512xi1>
    %129 = vector.broadcast %cst_15 : f32 to vector<8x512xf32>
    %130 = arith.select %128, %129, %124 : vector<8x512xi1>, vector<8x512xf32>
    %131 = tpu.concatenate %36, %44, %58, %72, %80, %94, %108, %116, %130 in 0 : vector<8x512xf32>, vector<8x512xf32>, vector<8x512xf32>, vector<8x512xf32>, vector<8x512xf32>, vector<8x512xf32>, vector<8x512xf32>, vector<8x512xf32>, vector<8x512xf32> -> vector<72x512xf32>
    %132 = arith.truncf %131 : vector<72x512xf32> to vector<72x512xbf16>
    %c0_16 = arith.constant 0 : index
    %c0_17 = arith.constant 0 : index
    %133 = vector.load %arg2[%c0_16, %c0_17] : memref<32x72xbf16, #tpu.memory_space<vmem>>, vector<32x72xbf16>
    %cst_18 = arith.constant dense<0.000000e+00> : vector<32x512xf32>
    %134 = tpu.matmul %133, %132, %cst_18 {dimension_numbers = #tpu.dot_dimension_numbers<[1], [0], [0], [1], [0, 0, 1, 1], [], []>} : vector<32x72xbf16>, vector<72x512xbf16>, vector<32x512xf32> -> vector<32x512xf32>
    %c0_19 = arith.constant 0 : index
    %c0_20 = arith.constant 0 : index
    %135 = vector.load %arg3[%c0_19, %c0_20] : memref<32x1xf32, #tpu.memory_space<vmem>>, vector<32x1xf32>
    %136 = vector.broadcast %135 : vector<32x1xf32> to vector<32x512xf32>
    %137 = arith.addf %134, %136 : vector<32x512xf32>
    %cst_21 = arith.constant 0.000000e+00 : f32
    %138 = vector.broadcast %cst_21 : f32 to vector<32x512xf32>
    %139 = arith.maximumf %137, %138 : vector<32x512xf32>
    %c0_22 = arith.constant 0 : index
    %c0_23 = arith.constant 0 : index
    %140 = vector.load %arg6[%c0_22, %c0_23] : memref<32x1xf32, #tpu.memory_space<vmem>>, vector<32x1xf32>
    %141 = vector.broadcast %140 : vector<32x1xf32> to vector<32x512xf32>
    %142 = arith.mulf %139, %141 : vector<32x512xf32>
    %cst_24 = arith.constant dense<0.000000e+00> : vector<512xf32>
    %143 = vector.multi_reduction <add>, %142, %cst_24 [0] : vector<32x512xf32> to vector<512xf32>
    %144 = vector.shape_cast %143 : vector<512xf32> to vector<1x512xf32>
    %c0_25 = arith.constant 0 : index
    %c0_26 = arith.constant 0 : index
    %145 = vector.load %arg7[%c0_25, %c0_26] : memref<1x1xf32, #tpu.memory_space<vmem>>, vector<1x1xf32>
    %146 = vector.broadcast %145 : vector<1x1xf32> to vector<1x512xf32>
    %147 = arith.addf %144, %146 : vector<1x512xf32>
    %148 = vector.extract_strided_slice %147 {offsets = [0, 0], sizes = [1, 256], strides = [1, 1]} : vector<1x512xf32> to vector<1x256xf32>
    %149 = vector.extract_strided_slice %147 {offsets = [0, 256], sizes = [1, 256], strides = [1, 1]} : vector<1x512xf32> to vector<1x256xf32>
    %150 = tpu.concatenate %148, %149 in 0 : vector<1x256xf32>, vector<1x256xf32> -> vector<2x256xf32>
    %c0_27 = arith.constant 0 : index
    %c0_28 = arith.constant 0 : index
    %151 = vector.load %arg9[%c0_27, %c0_28] : memref<2x256xf32, #tpu.memory_space<vmem>>, vector<2x256xf32>
    tpu.vector_store %arg9[%c0_27, %c0_28], %150 {strides = array<i32>} : memref<2x256xf32, #tpu.memory_space<vmem>>, vector<2x256xf32>,
    %152 = vector.extract_strided_slice %139 {offsets = [0, 0], sizes = [32, 256], strides = [1, 1]} : vector<32x512xf32> to vector<32x256xf32>
    %cst_29 = arith.constant dense<0.000000e+00> : vector<32xf32>
    %153 = vector.multi_reduction <add>, %152, %cst_29 [1] : vector<32x256xf32> to vector<32xf32>
    %154 = vector.shape_cast %153 : vector<32xf32> to vector<32x1xf32>
    %cst_30 = arith.constant 3.906250e-03 : f32
    %155 = vector.broadcast %cst_30 : f32 to vector<32x1xf32>
    %156 = arith.mulf %154, %155 : vector<32x1xf32>
    %c0_31 = arith.constant 0 : index
    %c0_32 = arith.constant 0 : index
    %157 = vector.load %arg4[%c0_31, %c0_32] : memref<32x128xf32, #tpu.memory_space<vmem>>, vector<32x128xf32>
    %158 = vector.broadcast %156 : vector<32x1xf32> to vector<32x128xf32>
    %159 = arith.mulf %158, %157 : vector<32x128xf32>
    %cst_33 = arith.constant dense<0.000000e+00> : vector<128xf32>
    %160 = vector.multi_reduction <add>, %159, %cst_33 [0] : vector<32x128xf32> to vector<128xf32>
    %161 = vector.shape_cast %160 : vector<128xf32> to vector<1x128xf32>
    %162 = vector.extract_strided_slice %139 {offsets = [0, 256], sizes = [32, 256], strides = [1, 1]} : vector<32x512xf32> to vector<32x256xf32>
    %cst_34 = arith.constant dense<0.000000e+00> : vector<32xf32>
    %163 = vector.multi_reduction <add>, %162, %cst_34 [1] : vector<32x256xf32> to vector<32xf32>
    %164 = vector.shape_cast %163 : vector<32xf32> to vector<32x1xf32>
    %cst_35 = arith.constant 3.906250e-03 : f32
    %165 = vector.broadcast %cst_35 : f32 to vector<32x1xf32>
    %166 = arith.mulf %164, %165 : vector<32x1xf32>
    %c0_36 = arith.constant 0 : index
    %c0_37 = arith.constant 0 : index
    %167 = vector.load %arg4[%c0_36, %c0_37] : memref<32x128xf32, #tpu.memory_space<vmem>>, vector<32x128xf32>
    %168 = vector.broadcast %166 : vector<32x1xf32> to vector<32x128xf32>
    %169 = arith.mulf %168, %167 : vector<32x128xf32>
    %cst_38 = arith.constant dense<0.000000e+00> : vector<128xf32>
    %170 = vector.multi_reduction <add>, %169, %cst_38 [0] : vector<32x128xf32> to vector<128xf32>
    %171 = vector.shape_cast %170 : vector<128xf32> to vector<1x128xf32>
    %172 = tpu.concatenate %161, %171 in 0 : vector<1x128xf32>, vector<1x128xf32> -> vector<2x128xf32>
    %c0_39 = arith.constant 0 : index
    %c0_40 = arith.constant 0 : index
    %173 = vector.load %arg5[%c0_39, %c0_40] : memref<1x128xf32, #tpu.memory_space<vmem>>, vector<1x128xf32>
    %174 = vector.broadcast %173 : vector<1x128xf32> to vector<2x128xf32>
    %175 = arith.addf %172, %174 : vector<2x128xf32>
    %c0_41 = arith.constant 0 : index
    %c0_42 = arith.constant 0 : index
    %176 = vector.load %arg8[%c0_41, %c0_42] : memref<2x128xf32, #tpu.memory_space<vmem>>, vector<2x128xf32>
    tpu.vector_store %arg8[%c0_41, %c0_42], %175 {strides = array<i32>} : memref<2x128xf32, #tpu.memory_space<vmem>>, vector<2x128xf32>,
    return
  }
  func.func @transform_0(%arg0: i32) -> (i32, i32) {
    %c0_i32 = arith.constant 0 : i32
    %c0_i32_0 = arith.constant 0 : i32
    %c0_i32_1 = arith.constant 0 : i32
    return %c0_i32, %c0_i32_0 : i32, i32
  }
  func.func @transform_1(%arg0: i32) -> (i32, i32) {
    %c0_i32 = arith.constant 0 : i32
    %c0_i32_0 = arith.constant 0 : i32
    %c0_i32_1 = arith.constant 0 : i32
    return %c0_i32, %c0_i32_0 : i32, i32
  }
  func.func @transform_2(%arg0: i32) -> (i32, i32) {
    %c0_i32 = arith.constant 0 : i32
    %c0_i32_0 = arith.constant 0 : i32
    %c0_i32_1 = arith.constant 0 : i32
    return %c0_i32, %c0_i32_0 : i32, i32
  }
  func.func @transform_3(%arg0: i32) -> (i32, i32) {
    %c0_i32 = arith.constant 0 : i32
    %c0_i32_0 = arith.constant 0 : i32
    %c0_i32_1 = arith.constant 0 : i32
    return %c0_i32, %c0_i32_0 : i32, i32
  }
  func.func @transform_4(%arg0: i32) -> (i32, i32) {
    %c0_i32 = arith.constant 0 : i32
    %c0_i32_0 = arith.constant 0 : i32
    %c0_i32_1 = arith.constant 0 : i32
    return %c0_i32, %c0_i32_0 : i32, i32
  }
  func.func @transform_5(%arg0: i32) -> (i32, i32) {
    %c0_i32 = arith.constant 0 : i32
    %c0_i32_0 = arith.constant 0 : i32
    %c0_i32_1 = arith.constant 0 : i32
    return %c0_i32, %c0_i32_0 : i32, i32
  }
  func.func @transform_6(%arg0: i32) -> (i32, i32) {
    %c0_i32 = arith.constant 0 : i32
    %c0_i32_0 = arith.constant 0 : i32
    %c0_i32_1 = arith.constant 0 : i32
    return %c0_i32, %c0_i32_0 : i32, i32
  }
  func.func @transform_7(%arg0: i32) -> (i32, i32) {
    %c0_i32 = arith.constant 0 : i32
    %c0_i32_0 = arith.constant 0 : i32
    %c0_i32_1 = arith.constant 0 : i32
    return %c0_i32, %c0_i32_0 : i32, i32
  }
  func.func @transform_8(%arg0: i32) -> (i32, i32) {
    %c0_i32 = arith.constant 0 : i32
    %c0_i32_0 = arith.constant 0 : i32
    %c0_i32_1 = arith.constant 0 : i32
    return %c0_i32, %c0_i32_0 : i32, i32
  }
}

</mosaic_0001>

<bundles_post_ra>
// kernel: model_forward.1
= control target key start
LH: loop header
LB: loop body
LE: loop exit
PB: predicated region body
PF: predicated region fallthrough
CT: control target
= control target key end

     0   :  { %s2166_s0 = inlined_call_operand.vmem [shape: f32[8,768], index: 0, kind: input, shape index: {}]   ;;  %s2167_s1 = inlined_call_operand.vmem [shape: bf16[32,72], index: 1, kind: input, shape index: {}]   ;;  %s2168_s2 = inlined_call_operand.vmem [shape: f32[32,1], index: 2, kind: input, shape index: {}]   ;;  %s2169_s3 = inlined_call_operand.vmem [shape: f32[32,128], index: 3, kind: input, shape index: {}]   ;;  %s2170_s4 = inlined_call_operand.vmem [shape: f32[1,128], index: 4, kind: input, shape index: {}]   ;;  %s2171_s5 = inlined_call_operand.vmem [shape: f32[32,1], index: 5, kind: input, shape index: {}]   ;;  %s2172_s6 = inlined_call_operand.<no memory space> [shape: f32[1,1], index: 6, kind: input, shape index: {}]   ;;  %s2173_s7 = inlined_call_operand.hbm [shape: f32[2,128], index: 7, kind: output, shape index: {0}]   ;;  %s2174_s8 = inlined_call_operand.vmem [shape: f32[2,256], index: 8, kind: output, shape index: {1}]  }
   0x1   :  { %v14_v0 = vstv %s2172_s6 }
   0x2   :  { %15 = vst [vmem:[#allocation2] sm:$0x1] %v14_v0 }
   0x3   :  { %v36_v1 = vld [vmem:[%s2166_s0 + $0x20] sm:$0xff]  ;;  %v1338_v2 = vld [vmem:[%s2166_s0 + $0x28] sm:$0xff]  ;;  %v38_v4 = vlaneseq }
   0x4   :  { %v32_v3 = vld [vmem:[%s2166_s0] sm:$0xff]  ;;  %v972_v5 = vpack.i.bf16 %v1338_v2, %v36_v1  ;;  %v1347_v6 = vld [vmem:[%s2166_s0 + $0x8] sm:$0xff] }
   0x5   :  { %v962_v7 = vpack.i.bf16 %v1347_v6, %v32_v3  ;;  %v1350_v8 = vand.u32 127, %v38_v4 }
   0x6   :  { %16 = vsyncpa [#allocation4], 0  ;;  %s1262_s6 = smov 113   ;;  %s1263_s15 = smov 127   ;;  %v34_v9 = vld [vmem:[%s2166_s0 + $0x10] sm:$0xff]  ;;  %v35_v10 = vld [vmem:[%s2166_s0 + $0x18] sm:$0xff]  ;;  %v1082_v14 = vpack.i.bf16 %v32_v3, %v36_v1  ;;  %v1072_v15 = vpack.i.bf16 %v32_v3, %v1338_v2  ;;  %v1389_v18 = vpack.i.bf16 %v1338_v2, %v1347_v6 }
   0x7   :  { %973 = vrot.lane.b32.xlu2 %v972_v5, %s1262_s6  ;;  %963 = vrot.lane.b32.xlu1 %v962_v7, %s1262_s6  ;;  %v1359_v11 = vpack.i.bf16 %v35_v10, %v34_v9  ;;  %v1362_v12 = vadd.s32 128, %v1350_v8  ;;  %s1264_s20 = smov 15   ;;  %s1265_s21 = smov 112   ;;  %v1067_v13 = vpack.i.bf16 %v36_v1, %v35_v10  ;;  %v1127_v16 = vpack.i.bf16 %v34_v9, %v1347_v6 }
   0x8   :  { %41 = vrot.lane.b32.xlu0 %v1350_v8, %s1263_s15  ;;  %s1266_s22 = smov 16   ;;  %s1267_s0 = smov 111   ;;  %v1276_v19 = vmov 0   ;;  %vm45_vm0 = vcmp.lt.s32.totalorder %v1350_v8, 127  ;;  %vm110_vm1 = vcmp.lt.s32.totalorder %v1350_v8, 113  ;;  %vm127_vm3 = vcmp.lt.s32.totalorder %v1350_v8, 15 }
   0x9   :  { %s1268_s23 = smov 17   ;;  %s1269_s24 = smov 97   ;;  %1234 = vset.pattern.permute.xlu1 %v1276_v19  ;;  %1233 = vset.pattern.permute.xlu0 %v1276_v19  ;;  %vm168_vm4 = vcmp.lt.s32.totalorder %v1350_v8, 112  ;;  %vm185_vm5 = vcmp.lt.s32.totalorder %v1350_v8, 16  ;;  %vm206_vm6 = vcmp.lt.s32.totalorder %v1350_v8, 111  ;;  %vm223_vm7 = vcmp.lt.s32.totalorder %v1350_v8, 17 }
   0xa   :  { %s1270_s25 = smov 79   ;;  %s1271_s26 = smov 49   ;;  %1232 = vset.pattern.permute.xlu2 %v1276_v19  ;;  %vm2183_vm8 = vcmp.lt.s32.totalorder %v1350_v8, 97  ;;  %vm462_vm9 = vcmp.lt.s32.totalorder %v1350_v8, 79  ;;  %vm479_vm10 = vcmp.lt.s32.totalorder %v1350_v8, 49  ;;  %vm557_vm14 = vcmask 1043456  }
   0xb   :  { %s1272_s27 = smov 47   ;;  %s1273_s28 = smov 81   ;;  %vm2182_vm15 = vcmp.lt.s32.totalorder %v1350_v8, 47 }
   0xc   :  { %s1274_s29 = smov 80   ;;  %s1275_s30 = smov 48  }
   0xd   :  { %s1277_s9 = smov 96   ;;  %s1278_s10 = smov 95  }
   0xe   :  { %s1279_s11 = smov 32   ;;  %s1280_s12 = smov 33  }
   0xf   :  { %978 = vrot.lane.b32.xlu2 %v962_v7, %s1264_s20  ;;  %968 = vrot.lane.b32.xlu1 %v1359_v11, %s1262_s6  ;;  %s1281_s13 = smov 31   ;;  %s1283_s16 = smov [#allocation3]  }
  0x10   :  { %43 = vrot.lane.b32.xlu0 %v1362_v12, %s1263_s15  ;;  %s833_s17 = sshll.u32 %s1283_s16, 4  ;;  %s834_s17 = int_to_ptr.vmem [resolvable:$true] %s833_s17 }
  0x17   :  { %993 = vrot.lane.b32.xlu2 %v962_v7, %s1265_s21  ;;  %988 = vrot.lane.b32.xlu1 %v972_v5, %s1264_s20 }
  0x18   :  { %983 = vrot.lane.b32.xlu0 %v1359_v11, %s1264_s20  ;;  %s835_s20 = sshll.u32 %s2173_s7, 4  ;;  %s836_s20 = int_to_ptr.hbm [resolvable:$true] %s835_s20 }
  0x1f   :  { %1008 = vrot.lane.b32.xlu2 %v962_v7, %s1266_s22  ;;  %1003 = vrot.lane.b32.xlu1 %v972_v5, %s1265_s21 }
  0x20   :  { %998 = vrot.lane.b32.xlu0 %v1359_v11, %s1265_s21 }
  0x27   :  { %1023 = vrot.lane.b32.xlu2 %v962_v7, %s1267_s0  ;;  %1018 = vrot.lane.b32.xlu1 %v972_v5, %s1266_s22 }
  0x28   :  { %1013 = vrot.lane.b32.xlu0 %v1359_v11, %s1266_s22 }
  0x2f   :  { %1038 = vrot.lane.b32.xlu2 %v962_v7, %s1268_s23  ;;  %1033 = vrot.lane.b32.xlu1 %v972_v5, %s1267_s0 }
  0x30   :  { %1028 = vrot.lane.b32.xlu0 %v1359_v11, %s1267_s0 }
  0x37   :  { %1053 = vrot.lane.b32.xlu2 %v962_v7, %s1269_s24  ;;  %1048 = vrot.lane.b32.xlu1 %v972_v5, %s1268_s23 }
  0x38   :  { %1043 = vrot.lane.b32.xlu0 %v1359_v11, %s1268_s23 }
  0x3f   :  { %1068 = vrot.lane.b32.xlu2 %v1067_v13, %s1270_s25  ;;  %1063 = vrot.lane.b32.xlu1 %v972_v5, %s1269_s24 }
  0x40   :  { %1058 = vrot.lane.b32.xlu0 %v1359_v11, %s1269_s24 }
  0x47   :  { %1083 = vrot.lane.b32.xlu2 %v1082_v14, %s1271_s26  ;;  %1078 = vrot.lane.b32.xlu1 %v1359_v11, %s1271_s26 }
  0x48   :  { %1073 = vrot.lane.b32.xlu0 %v1072_v15, %s1270_s25 }
  0x4f   :  { %1098 = vrot.lane.b32.xlu2 %v1359_v11, %s1272_s27  ;;  %1093 = vrot.lane.b32.xlu1 %v1072_v15, %s1273_s28 }
  0x50   :  { %1088 = vrot.lane.b32.xlu0 %v1067_v13, %s1273_s28 }
  0x57   :  { %1113 = vrot.lane.b32.xlu2 %v1072_v15, %s1274_s29  ;;  %1108 = vrot.lane.b32.xlu1 %v1067_v13, %s1274_s29 }
  0x58   :  { %1103 = vrot.lane.b32.xlu0 %v1082_v14, %s1272_s27 }
  0x5f   :  { %1128 = vrot.lane.b32.xlu2 %v1127_v16, %s1270_s25  ;;  %1123 = vrot.lane.b32.xlu1 %v1082_v14, %s1275_s30 }
  0x60   :  { %1118 = vrot.lane.b32.xlu0 %v1359_v11, %s1275_s30 }
  0x61   :  { %v1385_v17 = vpop.permute.xlu2 %973 }
  0x62   :  { %v975_v25 = vunpack.i.l.bf16 %v1385_v17 }
  0x67   :  { %1143 = vrot.lane.b32.xlu2 %v1072_v15, %s1277_s9  ;;  %1138 = vrot.lane.b32.xlu1 %v1067_v13, %s1277_s9 }
  0x68   :  { %1133 = vrot.lane.b32.xlu0 %v1389_v18, %s1271_s26 }
  0x69   :  { %v1394_v20 = vpop.permute.xlu2 %978 }
  0x6a   :  { %v980_v36 = vunpack.i.l.bf16 %v1394_v20 }
  0x6f   :  { %1158 = vrot.lane.b32.xlu2 %v1067_v13, %s1278_s10  ;;  %1153 = vrot.lane.b32.xlu1 %v1082_v14, %s1279_s11 }
  0x70   :  { %1148 = vrot.lane.b32.xlu0 %v1359_v11, %s1279_s11 }
  0x71   :  { %v1400_v21 = vpop.permute.xlu2 %993 }
  0x72   :  { %v996_v45 = vunpack.i.h.bf16 %v1400_v21 }
  0x77   :  { %1173 = vrot.lane.b32.xlu2 %v1082_v14, %s1280_s12  ;;  %1168 = vrot.lane.b32.xlu1 %v1359_v11, %s1280_s12 }
  0x78   :  { %1163 = vrot.lane.b32.xlu0 %v1072_v15, %s1278_s10 }
  0x79   :  { %v1406_v22 = vpop.permute.xlu2 %1008  ;;  %v1408_v23 = vpop.permute.xlu1 %963 }
  0x7a   :  { %v42_v24 = vpop.permute.xlu0 %41  ;;  %v966_v29 = vunpack.i.h.bf16 %v1408_v23  ;;  %v1010_v54 = vunpack.i.l.bf16 %v1406_v22 }
  0x7f   :  { %1188 = vrot.lane.b32.xlu2 %v1127_v16, %s1274_s29  ;;  %1183 = vrot.lane.b32.xlu1 %v1389_v18, %s1272_s27 }
  0x80   :  { %1178 = vrot.lane.b32.xlu0 %v1127_v16, %s1273_s28 }
  0x81   :  { %v1416_v26 = vpop.permute.xlu2 %1023  ;;  %v969_v27 = vpop.permute.xlu1 %968 }
  0x82   :  { %v44_v28 = vpop.permute.xlu0 %43  ;;  %v971_v30 = vunpack.i.h.bf16 %v969_v27  ;;  %v970_v31 = vunpack.i.l.bf16 %v969_v27  ;;  %v1026_v63 = vunpack.i.h.bf16 %v1416_v26 }
  0x83   :  { %v46_v32 = vsel %vm45_vm0, %v42_v24, %v44_v28  ;;  %vm2181_vm0 = vcmp.lt.s32.totalorder %v1350_v8, 81 }
  0x84   :  { %vm47_vm2 = vcmp.lt.s32.totalorder %v46_v32, 384  ;;  %v1424_v33 = vsel %vm110_vm1, %v971_v30, %v975_v25  ;;  %v1430_v34 = vsel %vm110_vm1, %v966_v29, %v970_v31 }
  0x85   :  { %v132_v35 = vsel %vm47_vm2, 1, %v1276_v19  ;;  %v976_v19 = vunpack.i.h.bf16 %v1385_v17  ;;  %v981_v17 = vunpack.i.h.bf16 %v1394_v20  ;;  %vm2179_vm2 = vcmp.lt.s32.totalorder %v1350_v8, 48 }
  0x86   :  { %938 = vpush %v132_v35 }
  0x87   :  { %1203 = vrot.lane.b32.xlu2 %v1082_v14, %s1281_s13  ;;  %1198 = vrot.lane.b32.xlu1 %v1359_v11, %s1281_s13  ;;  %v1531_v28 = vsel %vm110_vm1, %v975_v25, %v976_v19  ;;  %v965_v25 = vunpack.i.l.bf16 %v1408_v23 }
  0x88   :  { %1193 = vrot.lane.b32.xlu0 %v1389_v18, %s1275_s30 }
  0x89   :  { %v1436_v37 = vpop.permute.xlu2 %1038  ;;  %v989_v38 = vpop.permute.xlu1 %988 }
  0x8a   :  { %v1439_v39 = vpop.permute.xlu0 %983  ;;  %v991_v40 = vunpack.i.h.bf16 %v989_v38  ;;  %v990_v41 = vunpack.i.l.bf16 %v989_v38  ;;  %v1040_v9 = vunpack.i.l.bf16 %v1436_v37 }
  0x8b   :  { %v986_v42 = vunpack.i.h.bf16 %v1439_v39  ;;  %v985_v30 = vunpack.i.l.bf16 %v1439_v39 }
  0x8c   :  { %v1446_v43 = vsel %vm127_vm3, %v991_v40, %v980_v36 }
  0x8d   :  { %v1452_v44 = vsel %vm127_vm3, %v986_v42, %v990_v41  ;;  %v1539_v41 = vadd.s32 256, %v1350_v8 }
  0x8f   :  { %1218 = vrot.lane.b32.xlu2 %v1127_v16, %s1278_s10  ;;  %1213 = vrot.lane.b32.xlu1 %v1389_v18, %s1279_s11 }
  0x90   :  { %1208 = vrot.lane.b32.xlu0 %v1127_v16, %s1277_s9 }
  0x91   :  { %v1460_v46 = vpop.permute.xlu1 %1003  ;;  %v1462_v48 = vpop.permute.xlu2 %1053 }
  0x92   :  { %v999_v47 = vpop.permute.xlu0 %998  ;;  %v1005_v49 = vunpack.i.l.bf16 %v1460_v46  ;;  %v2175_v24 = vunpack.i.h.bf16 %v1462_v48 }
  0x93   :  { %v1001_v50 = vunpack.i.h.bf16 %v999_v47  ;;  %v1000_v51 = vunpack.i.l.bf16 %v999_v47  ;;  %v995_v47 = vunpack.i.l.bf16 %v1400_v21 }
  0x95   :  { %v1469_v52 = vsel %vm168_vm4, %v1001_v50, %v1005_v49  ;;  %v1475_v53 = vsel %vm168_vm4, %v996_v45, %v1000_v51  ;;  %v1545_v50 = vadd.s32 384, %v1350_v8 }
  0x97   :  { %1228 = vrot.lane.b32.xlu1 %v1389_v18, %s1281_s13 }
  0x98   :  { %1223 = vrot.lane.b32.xlu0 %v1389_v18, %s1280_s12 }
  0x99   :  { %v1019_v55 = vpop.permute.xlu1 %1018  ;;  %v1485_v60 = vpop.permute.xlu2 %1068 }
  0x9a   :  { %v1482_v56 = vpop.permute.xlu0 %1013  ;;  %v1021_v57 = vunpack.i.h.bf16 %v1019_v55  ;;  %v1020_v58 = vunpack.i.l.bf16 %v1019_v55 }
  0x9b   :  { %v1016_v59 = vunpack.i.h.bf16 %v1482_v56 }
  0x9c   :  { %v1491_v61 = vsel %vm185_vm5, %v1021_v57, %v1010_v54 }
  0x9d   :  { %v1495_v62 = vsel %vm185_vm5, %v1016_v59, %v1020_v58 }
  0xa1   :  { %v1034_v0 = vpop.permute.xlu1 %1033  ;;  %v1509_v7 = vpop.permute.xlu2 %1083 }
  0xa2   :  { %v1029_v1 = vpop.permute.xlu0 %1028  ;;  %v1035_v2 = vunpack.i.l.bf16 %v1034_v0  ;;  %v1036_v51 = vunpack.i.h.bf16 %v1034_v0  ;;  %v1015_v0 = vunpack.i.l.bf16 %v1482_v56  ;;  %v1085_v56 = vunpack.i.l.bf16 %v1509_v7 }
  0xa3   :  { %v1031_v3 = vunpack.i.h.bf16 %v1029_v1  ;;  %v1030_v4 = vunpack.i.l.bf16 %v1029_v1  ;;  %v1025_v1 = vunpack.i.l.bf16 %v1416_v26 }
  0xa4   :  { %v1576_v39 = vsel %vm206_vm6, %v1035_v2, %v1036_v51 }
  0xa5   :  { %v1501_v5 = vsel %vm206_vm6, %v1031_v3, %v1035_v2  ;;  %v1507_v6 = vsel %vm206_vm6, %v1026_v63, %v1030_v4  ;;  %v1071_v3 = vunpack.i.h.bf16 %v1485_v60  ;;  %v1070_v4 = vunpack.i.l.bf16 %v1485_v60 }
  0xa6   :  { %v2177_v60 = vand.u32 15, %v1545_v50 }
  0xa8   :  { %vm1611_vm13 = vcmp.eq.s32.totalorder %v2177_v60, 15 }
  0xa9   :  { %v1049_v10 = vpop.permute.xlu1 %1048  ;;  %v1525_v27 = vpop.permute.xlu2 %1098 }
  0xaa   :  { %v1044_v11 = vpop.permute.xlu0 %1043  ;;  %v1051_v13 = vunpack.i.h.bf16 %v1049_v10  ;;  %v1050_v14 = vunpack.i.l.bf16 %v1049_v10  ;;  %v1041_v10 = vunpack.i.h.bf16 %v1436_v37 }
  0xab   :  { %v1046_v15 = vunpack.i.h.bf16 %v1044_v11  ;;  %v1045_v55 = vunpack.i.l.bf16 %v1044_v11  ;;  %v129_v11 = vsel %vm127_vm3, %v985_v30, %v986_v42 }
  0xac   :  { %v1517_v16 = vsel %vm223_vm7, %v1051_v13, %v1040_v9  ;;  %v2178_v13 = vand.u32 15, %v1539_v41  ;;  %v1650_v23 = vsel %vm223_vm7, %v1040_v9, %v1041_v10 }
  0xad   :  { %v1521_v18 = vsel %vm223_vm7, %v1046_v15, %v1050_v14  ;;  %v1006_v14 = vunpack.i.h.bf16 %v1460_v46  ;;  %v1580_v42 = vsel %vm223_vm7, %v1045_v55, %v1046_v15 }
  0xae   :  { %vm1605_vm12 = vcmp.eq.s32.totalorder %v2178_v13, 15 }
  0xb1   :  { %v1535_v31 = vpop.permute.xlu1 %1063  ;;  %v1600_v51 = vpop.permute.xlu2 %1113 }
  0xb2   :  { %v1059_v32 = vpop.permute.xlu0 %1058  ;;  %v2176_v35 = vunpack.i.l.bf16 %v1535_v31 }
  0xb3   :  { %v1061_v38 = vunpack.i.h.bf16 %v1059_v32  ;;  %v1060_v40 = vunpack.i.l.bf16 %v1059_v32  ;;  %v187_v32 = vsel %vm185_vm5, %v1015_v0, %v1016_v59 }
  0xb5   :  { %v1551_v57 = vsel %vm2183_vm8, %v1061_v38, %v2176_v35  ;;  %v1557_v58 = vsel %vm2183_vm8, %v2175_v24, %v1060_v40  ;;  %v464_v24 = vsel %vm462_vm9, %v1070_v4, %v1071_v3  ;;  %v1011_v35 = vunpack.i.h.bf16 %v1406_v22  ;;  %vm2190_vm8 = vmneg %vm1611_vm13 }
  0xb7   :  { %s939_s14 = spop %938  ;;  %v188_v21 = vsel %vm185_vm5, %v1010_v54, %v1011_v35  ;;  %vm2188_vm5 = vmmov 1  }
  0xb8   :  { %v134_v19 = vstv %s939_s14 }
  0xb9   :  { %vm1582_vm11 = vcmp.eq.s32.totalorder %v134_v19, 1  ;;  %v1079_v38 = vpop.permute.xlu1 %1078 }
  0xba   :  { %v1588_v40 = vpop.permute.xlu0 %1073  ;;  %v1081_v55 = vunpack.i.h.bf16 %v1079_v38  ;;  %v1080_v59 = vunpack.i.l.bf16 %v1079_v38  ;;  %v138_v15 = vsel %vm1582_vm11, %v1424_v33, %v129_v11  ;;  %v192_v38 = vsel %vm1582_vm11, %v1469_v52, %v187_v32 }
  0xbb   :  { %v1075_v0 = vunpack.i.l.bf16 %v1588_v40  ;;  %v139_v2 = vsel %vm1582_vm11, %v1531_v28, %v1452_v44  ;;  %v114_v52 = vsel %vm110_vm1, %v965_v25, %v966_v29  ;;  %v1640_v44 = vsel %vm206_vm6, %v1025_v1, %v1026_v63 }
  0xbc   :  { %v481_v60 = vsel %vm479_vm10, %v1080_v59, %v1081_v55  ;;  %v480_v33 = vsel %vm479_vm10, %v1081_v55, %v1085_v56  ;;  %v169_v63 = vsel %vm168_vm4, %v1005_v49, %v1006_v14  ;;  %v1660_v1 = vpack.c.bf16 %v192_v38, %v138_v15 }
  0xbd   :  { %v463_v13 = vsel %vm462_vm9, %v1071_v3, %v1075_v0  ;;  %v486_v28 = vsel %vm1582_vm11, %v464_v24, %v481_v60  ;;  %v193_v37 = vsel %vm1582_vm11, %v169_v63, %v1495_v62  ;;  %v228_v9 = vsel %vm1582_vm11, %v1640_v44, %v1517_v16  ;;  %v519_v16 = vld [vmem:[%s2168_s2 + $0x18] sm:$0xff] }
  0xbe   :  { %v487_v3 = vsel %vm1582_vm11, %v463_v13, %v480_v33  ;;  %v490_v29 = vsel %vm1605_vm12, 0.0, %v486_v28  ;;  %v229_v46 = vsel %vm1582_vm11, %v1507_v6, %v1650_v23  ;;  %v136_v49 = vsel %vm1582_vm11, %v114_v52, %v1446_v43  ;;  %v933_v6 = vld [vmem:[%s2167_s1 + $0x8] sm:$0xff] }
  0xbf   :  { %v491_v26 = vsel %vm1611_vm13, 0.0, %v487_v3  ;;  %v510_v24 = vpack.c.bf16 %v490_v29, %v490_v29  ;;  %v130_v14 = vsel %vm127_vm3, %v980_v36, %v981_v17  ;;  %v172_v43 = vsel %vm168_vm4, %v995_v47, %v996_v45  ;;  %v1129_v36 = vpop.permute.xlu2 %1128 }
  0xc0   :  { %v511_v25 = vpack.c.bf16 %v491_v26, %v491_v26  ;;  %v1692_v60 = vpack.c.bf16 %v193_v37, %v139_v2  ;;  %v190_v56 = vsel %vm1582_vm11, %v172_v43, %v1491_v61  ;;  %v137_v20 = vsel %vm1582_vm11, %v1430_v34, %v130_v14 }
  0xc1   :  { %v1676_v10 = vpop.permute.xlu1 %1093  ;;  %v565_v13 = vsel %vm557_vm14, %v510_v24, 0  ;;  %v1704_v17 = vpack.c.bf16 %v190_v56, %v136_v49  ;;  %v191_v45 = vsel %vm1582_vm11, %v1475_v53, %v188_v21  ;;  %v1101_v2 = vunpack.i.h.bf16 %v1525_v27 }
  0xc2   :  { %v1089_v11 = vpop.permute.xlu0 %1088  ;;  %v568_v62 = vsel %vm557_vm14, %v511_v25, 0  ;;  %611 = vmatpush.bf16.msra.mxu2 %v565_v13  ;;  %v1709_v47 = vpack.c.bf16 %v191_v45, %v137_v20  ;;  %v1100_v34 = vunpack.i.l.bf16 %v1525_v27  ;;  %v1095_v55 = vunpack.i.l.bf16 %v1676_v10 }
  0xc3   :  { %630 = vmatpush.bf16.msra.mxu3 %v568_v62  ;;  %v1091_v22 = vunpack.i.h.bf16 %v1089_v11  ;;  %v1090_v54 = vunpack.i.l.bf16 %v1089_v11  ;;  %vm2180_vm1 = vcmp.lt.s32.totalorder %v1350_v8, 80  ;;  %v1115_v59 = vunpack.i.l.bf16 %v1600_v51 }
  0xc4   :  { %v401_v53 = vsel %vm2182_vm15, %v1100_v34, %v1101_v2  ;;  %v2197_v28 = vand.u32 15, %v1539_v41  ;;  %v2200_v29 = vand.u32 15, %v1545_v50  ;;  %v1131_v45 = vunpack.i.h.bf16 %v1129_v36 }
  0xc5   :  { %v384_v38 = vsel %vm2181_vm0, %v1090_v54, %v1091_v22  ;;  %v383_v41 = vsel %vm2181_vm0, %v1091_v22, %v1095_v55  ;;  %v54_v34 = vand.u32 15, %v1350_v8  ;;  %v61_v22 = vand.u32 15, %v1362_v12 }
  0xc6   :  { %vm1732_vm3 = vcmp.ne.s32.totalorder %v2197_v28, 0  ;;  %vm1738_vm4 = vcmp.ne.s32.totalorder %v2200_v29, 0  ;;  %v406_v14 = vsel %vm1582_vm11, %v384_v38, %v401_v53  ;;  %v1130_v54 = vunpack.i.l.bf16 %v1129_v36 }
  0xc7   :  { %v1716_v35 = vpop.permute.xlu2 %1143  ;;  %vm1758_vm6 = vmpackc.low %vm2188_vm5, %vm1732_vm3  ;;  %vm2185_vm0 = vcmp.lt.s32.totalorder %v1350_v8, 33 }
  0xc8   :  { %vm1773_vm7 = vmpackc.low %vm2188_vm5, %vm1738_vm4 }
  0xc9   :  { %v1109_v32 = vpop.permute.xlu1 %1108 }
  0xca   :  { %v1711_v61 = vpop.permute.xlu0 %1103  ;;  %v1111_v27 = vunpack.i.h.bf16 %v1109_v32  ;;  %v1110_v0 = vunpack.i.l.bf16 %v1109_v32 }
  0xcb   :  { %v1105_v15 = vunpack.i.l.bf16 %v1711_v61 }
  0xcc   :  { %v425_v49 = vsel %vm2180_vm1, %v1111_v27, %v1115_v59  ;;  %v426_v50 = vsel %vm2180_vm1, %v1110_v0, %v1111_v27  ;;  %v1086_v27 = vunpack.i.h.bf16 %v1509_v7  ;;  %vm1795_vm1 = vcmp.eq.s32.totalorder %v61_v22, 15 }
  0xcd   :  { %v400_v63 = vsel %vm2182_vm15, %v1101_v2, %v1105_v15  ;;  %v1076_v15 = vunpack.i.h.bf16 %v1588_v40  ;;  %vm898_vm15 = vmneg %vm1605_vm12  ;;  %vm2225_vm12 = vcmp.lt.s32.totalorder %v1350_v8, 48 }
  0xce   :  { %v407_v56 = vsel %vm1582_vm11, %v383_v41, %v400_v63 }
  0xcf   :  { %v1159_v53 = vpop.permute.xlu2 %1158  ;;  %v466_v7 = vsel %vm462_vm9, %v1076_v15, %v1130_v54 }
  0xd1   :  { %v1728_v33 = vpop.permute.xlu1 %1123 }
  0xd2   :  { %v1119_v52 = vpop.permute.xlu0 %1118  ;;  %v1125_v24 = vunpack.i.l.bf16 %v1728_v33 }
  0xd3   :  { %v1121_v25 = vunpack.i.h.bf16 %v1119_v52  ;;  %v1120_v37 = vunpack.i.l.bf16 %v1119_v52  ;;  %v465_v52 = vsel %vm462_vm9, %v1130_v54, %v1131_v45  ;;  %vm2186_vm9 = vcmp.lt.s32.totalorder %v1350_v8, 95 }
  0xd4   :  { %v1145_v54 = vunpack.i.l.bf16 %v1716_v35 }
  0xd5   :  { %v442_v11 = vsel %vm2179_vm2, %v1121_v25, %v1125_v24  ;;  %v443_v13 = vsel %vm2179_vm2, %v1120_v37, %v1121_v25  ;;  %vm1789_vm2 = vcmp.eq.s32.totalorder %v54_v34, 15 }
  0xd6   :  { %v448_v43 = vsel %vm1582_vm11, %v426_v50, %v443_v13  ;;  %v449_v20 = vsel %vm1582_vm11, %v425_v49, %v442_v11 }
  0xd7   :  { %v896_v32 = vpack.c.bf16 %v448_v43, %v406_v14  ;;  %v915_v2 = vpack.c.bf16 %v449_v20, %v407_v56  ;;  %v1817_v43 = vpop.permute.xlu2 %1173  ;;  %v1161_v56 = vunpack.i.h.bf16 %v1159_v53  ;;  %v1160_v20 = vunpack.i.l.bf16 %v1159_v53 }
  0xd8   :  { %v1176_v21 = vunpack.i.h.bf16 %v1817_v43 }
  0xd9   :  { %897 = vmatpush.bf16.msk.msra.mxu2 %vm1758_vm6, %v896_v32  ;;  %916 = vmatpush.bf16.msk.msra.mxu3 %vm1773_vm7, %v915_v2  ;;  %v1139_v55 = vpop.permute.xlu1 %1138 }
  0xda   :  { %v1134_v59 = vpop.permute.xlu0 %1133  ;;  %v1141_v15 = vunpack.i.h.bf16 %v1139_v55 }
  0xdb   :  { %v1136_v0 = vunpack.i.h.bf16 %v1134_v59  ;;  %v1135_v38 = vunpack.i.l.bf16 %v1134_v59  ;;  %v1175_v59 = vunpack.i.l.bf16 %v1817_v43 }
  0xdd   :  { %v483_v28 = vsel %vm479_vm10, %v1136_v0, %v1086_v27  ;;  %v482_v29 = vsel %vm479_vm10, %v1086_v27, %v1135_v38  ;;  %vm2184_vm10 = vcmp.lt.s32.totalorder %v1350_v8, 32  ;;  %v1140_v27 = vunpack.i.l.bf16 %v1139_v55 }
  0xde   :  { %v484_v63 = vsel %vm1582_vm11, %v466_v7, %v483_v28  ;;  %v485_v24 = vsel %vm1582_vm11, %v465_v52, %v482_v29  ;;  %v342_v0 = vsel %vm2186_vm9, %v1160_v20, %v1161_v56 }
  0xdf   :  { %v488_v25 = vsel %vm1789_vm2, 0.0, %v484_v63  ;;  %v489_v37 = vsel %vm1795_vm1, 0.0, %v485_v24  ;;  %v1189_v24 = vpop.permute.xlu2 %1188 }
  0xe0   :  { %v508_v41 = vpack.c.bf16 %v488_v25, %v488_v25  ;;  %v509_v49 = vpack.c.bf16 %v489_v37, %v489_v37 }
  0xe1   :  { %v1813_v50 = vpop.permute.xlu1 %1153 }
  0xe2   :  { %v1149_v11 = vpop.permute.xlu0 %1148  ;;  %v559_v13 = vsel %vm557_vm14, %v508_v41, 0  ;;  %v562_v14 = vsel %vm557_vm14, %v509_v49, 0  ;;  %v1155_v45 = vunpack.i.l.bf16 %v1813_v50  ;;  %vm2187_vm14 = vcmp.lt.s32.totalorder %v1350_v8, 96 }
  0xe3   :  { %573 = vmatpush.bf16.msra.mxu0 %v559_v13  ;;  %592 = vmatpush.bf16.msra.mxu1 %v562_v14  ;;  %v1151_v32 = vunpack.i.h.bf16 %v1149_v11  ;;  %v1150_v2 = vunpack.i.l.bf16 %v1149_v11  ;;  %v303_v63 = vsel %vm2187_vm14, %v1141_v15, %v1145_v54  ;;  %v304_v25 = vsel %vm2187_vm14, %v1140_v27, %v1141_v15 }
  0xe4   :  { %v1066_v54 = vunpack.i.h.bf16 %v1535_v31  ;;  %vm2215_vm14 = vcmp.lt.s32.totalorder %v1350_v8, 81 }
  0xe5   :  { %v320_v53 = vsel %vm2184_vm10, %v1151_v32, %v1155_v45  ;;  %v321_v7 = vsel %vm2184_vm10, %v1150_v2, %v1151_v32  ;;  %vm899_vm10 = vmpackc.low %vm898_vm15, %vm2188_vm5 }
  0xe6   :  { %v326_v11 = vsel %vm1582_vm11, %v304_v25, %v321_v7  ;;  %v327_v14 = vsel %vm1582_vm11, %v303_v63, %v320_v53  ;;  %v1191_v53 = vunpack.i.h.bf16 %v1189_v24  ;;  %v1106_v7 = vunpack.i.h.bf16 %v1711_v61 }
  0xe7   :  { %v1190_v25 = vunpack.i.l.bf16 %v1189_v24 }
  0xe9   :  { %v1169_v38 = vpop.permute.xlu1 %1168 }
  0xea   :  { %v1830_v52 = vpop.permute.xlu0 %1163  ;;  %v1171_v28 = vunpack.i.h.bf16 %v1169_v38  ;;  %v1170_v29 = vunpack.i.l.bf16 %v1169_v38  ;;  %v1096_v38 = vunpack.i.h.bf16 %v1676_v10 }
  0xeb   :  { %v1165_v55 = vunpack.i.l.bf16 %v1830_v52 }
  0xec   :  { %v358_v37 = vsel %vm2185_vm0, %v1171_v28, %v1175_v59  ;;  %v359_v41 = vsel %vm2185_vm0, %v1170_v29, %v1171_v28  ;;  %vm918_vm0 = vmpackc.low %vm2190_vm8, %vm2188_vm5  ;;  %v1868_v28 = vpop.permute.xlu2 %1203  ;;  %v1116_v29 = vunpack.i.h.bf16 %v1600_v51  ;;  %vm2217_vm8 = vcmp.lt.s32.totalorder %v1350_v8, 80 }
  0xed   :  { %v341_v49 = vsel %vm2186_vm9, %v1161_v56, %v1165_v55  ;;  %v364_v13 = vsel %vm1582_vm11, %v342_v0, %v359_v41  ;;  %v2211_v55 = vunpack.i.l.bf16 %v1535_v31  ;;  %vm2216_vm5 = vmmov %vm2215_vm14  ;;  %v1126_v31 = vunpack.i.h.bf16 %v1728_v33 }
  0xee   :  { %v365_v20 = vsel %vm1582_vm11, %v341_v49, %v358_v37  ;;  %v900_v56 = vpack.c.bf16 %v364_v13, %v326_v11  ;;  %v1205_v37 = vunpack.i.l.bf16 %v1868_v28  ;;  %v427_v49 = vsel %vm2217_vm8, %v1190_v25, %v1191_v53 }
  0xef   :  { %v919_v45 = vpack.c.bf16 %v365_v20, %v327_v14 }
  0xf0   :  { %901 = vmatpush.bf16.msk.msra.mxu2 %vm899_vm10, %v900_v56  ;;  %vm2213_vm10 = vcmp.lt.s32.totalorder %v1350_v8, 47 }
  0xf1   :  { %920 = vmatpush.bf16.msk.msra.mxu3 %vm918_vm0, %v919_v45  ;;  %v1184_v32 = vpop.permute.xlu1 %1183  ;;  %vm2212_vm0 = vcmp.lt.s32.totalorder %v1350_v8, 97  ;;  %vm2214_vm9 = vmmov %vm2213_vm10 }
  0xf2   :  { %v1179_v2 = vpop.permute.xlu0 %1178  ;;  %v1186_v15 = vunpack.i.h.bf16 %v1184_v32  ;;  %v1185_v59 = vunpack.i.l.bf16 %v1184_v32  ;;  %v261_v63 = vsel %vm2212_vm0, %v2211_v55, %v1066_v54  ;;  %vm277_vm0 = vcmp.lt.s32.totalorder %v1350_v8, 31 }
  0xf3   :  { %v1181_v27 = vunpack.i.h.bf16 %v1179_v2  ;;  %v1180_v0 = vunpack.i.l.bf16 %v1179_v2 }
  0xf4   :  { %v403_v41 = vsel %vm2213_vm10, %v1186_v15, %v1106_v7  ;;  %v402_v10 = vsel %vm2214_vm9, %v1106_v7, %v1185_v59  ;;  %vm1890_vm10 = vcmp.ne.s32.totalorder %v54_v34, 0  ;;  %vm1911_vm9 = vcmp.ne.s32.totalorder %v61_v22, 0  ;;  %v518_v22 = vld [vmem:[%s2168_s2 + $0x10] sm:$0xff] }
  0xf5   :  { %v385_v61 = vsel %vm2215_vm14, %v1180_v0, %v1181_v27  ;;  %v386_v51 = vsel %vm2216_vm5, %v1096_v38, %v1180_v0  ;;  %vm2220_vm5 = vmmov %vm2217_vm8  ;;  %v517_v27 = vld [vmem:[%s2168_s2 + $0x8] sm:$0xff]  ;;  %532 = vperm.xlu1 %1234, %v518_v22  }
  0xf6   :  { %v428_v33 = vsel %vm2220_vm5, %v1116_v29, %v1190_v25  ;;  %vm1901_vm8 = vmpackc.low %vm1732_vm3, %vm898_vm15  ;;  %v404_v34 = vsel %vm1582_vm11, %v386_v51, %v403_v41  ;;  %v405_v2 = vsel %vm1582_vm11, %v385_v61, %v402_v10  ;;  %v2234_v29 = vsel %vm1582_vm11, %v1576_v39, %v1521_v18  ;;  %527 = vperm.xlu0 %1233, %v517_v27   ;;  %v662_v39 = vld [vmem:[%s2171_s5] sm:$0xff]  ;;  %v1219_v41 = vpop.permute.xlu2 %1218 }
  0xf7   :  { %vm2226_vm15 = vmmov %vm2225_vm12 }
  0xf8   :  { %vm2227_vm3 = vmneg %vm1611_vm13  ;;  %vm2230_vm13 = vmmov 1  }
  0xf9   :  { %v1199_v24 = vpop.permute.xlu1 %1198  ;;  %vm1928_vm14 = vmpackc.low %vm1738_vm4, %vm2227_vm3  ;;  %vm2241_vm3 = vcmp.lt.s32.totalorder %v1350_v8, 95 }
  0xfa   :  { %v1194_v11 = vpop.permute.xlu0 %1193  ;;  %v1201_v14 = vunpack.i.h.bf16 %v1199_v24  ;;  %v1200_v20 = vunpack.i.l.bf16 %v1199_v24  ;;  %vm1948_vm4 = vmpackc.low %vm2230_vm13, %vm1890_vm10  ;;  %v1146_v24 = vunpack.i.h.bf16 %v1716_v35 }
  0xfb   :  { %v1196_v56 = vunpack.i.h.bf16 %v1194_v11  ;;  %v1195_v45 = vunpack.i.l.bf16 %v1194_v11  ;;  %vm1967_vm5 = vmpackc.low %vm2230_vm13, %vm1911_vm9  ;;  %v1156_v11 = vunpack.i.h.bf16 %v1813_v50  ;;  %v1206_v50 = vunpack.i.h.bf16 %v1868_v28 }
  0xfc   :  { %v278_v4 = vsel %vm277_vm0, %v1201_v14, %v1205_v37  ;;  %v279_v3 = vsel %vm277_vm0, %v1200_v20, %v1201_v14  ;;  %v1055_v14 = vunpack.i.l.bf16 %v1462_v48  ;;  %v1166_v20 = vunpack.i.h.bf16 %v1830_v52 }
  0xfd   :  { %v444_v15 = vsel %vm2225_vm12, %v1126_v31, %v1195_v45  ;;  %v445_v59 = vsel %vm2226_vm15, %v1196_v56, %v1126_v31  ;;  %v284_v0 = vsel %vm1582_vm11, %v1551_v57, %v279_v3  ;;  %v285_v19 = vsel %vm1582_vm11, %v261_v63, %v278_v4  ;;  %668 = vperm.xlu1 %1234, %v662_v39  }
  0xfe   :  { %v446_v26 = vsel %vm1582_vm11, %v428_v33, %v445_v59  ;;  %v447_v38 = vsel %vm1582_vm11, %v427_v49, %v444_v15  ;;  %v2233_v57 = vsel %vm1582_vm11, %v1501_v5, %v1580_v42  ;;  %v924_v55 = vpack.c.bf16 %v285_v19, %v2234_v29  ;;  %v1985_v42 = vld [vmem:[%s2167_s1] sm:$0xff] }
  0xff   :  { %v905_v7 = vpack.c.bf16 %v284_v0, %v2233_v57  ;;  %v858_v63 = vpack.c.bf16 %v446_v26, %v404_v34  ;;  %v877_v37 = vpack.c.bf16 %v447_v38, %v405_v2  ;;  %v1221_v49 = vunpack.i.h.bf16 %v1219_v41  ;;  %v664_v0 = vld [vmem:[%s2171_s5 + $0x10] sm:$0xff]  ;;  %v516_v19 = vld [vmem:[%s2168_s2] sm:$0xff] }
 0x100   :  { %925 = vmatpush.bf16.msk.msra.mxu3 %vm1928_vm14, %v924_v55  ;;  %v1220_v56 = vunpack.i.l.bf16 %v1219_v41  ;;  %vm860_vm14 = vmneg %vm1789_vm2  ;;  %v2242_v3 = vunpack.i.h.bf16 %v1462_v48  ;;  %678 = vperm.xlu0 %1233, %v664_v0  }
 0x101   :  { %906 = vmatpush.bf16.msk.msra.mxu2 %vm1901_vm8, %v905_v7  ;;  %v1214_v5 = vpop.permute.xlu1 %1213  ;;  %859 = vmatpush.bf16.msk.msra.mxu0 %vm1948_vm4, %v858_v63  ;;  %vm550_vm8 = vcmask 588800  }
 0x102   :  { %878 = vmatpush.bf16.msk.msra.mxu1 %vm1967_vm5, %v877_v37  ;;  %v1209_v18 = vpop.permute.xlu0 %1208  ;;  %v1216_v10 = vunpack.i.h.bf16 %v1214_v5  ;;  %v1215_v61 = vunpack.i.l.bf16 %v1214_v5  ;;  %v343_v52 = vsel %vm2241_vm3, %v1220_v56, %v1221_v49  ;;  %522 = vperm.xlu2 %1232, %v516_v19  }
 0x103   :  { %v1211_v51 = vunpack.i.h.bf16 %v1209_v18  ;;  %v1210_v31 = vunpack.i.l.bf16 %v1209_v18 }
 0x104   :  { %929 = vmatpush.bf16.msk.msra.mxu3 %vm1773_vm7, %v1692_v60  ;;  %vm2239_vm7 = vcmp.lt.s32.totalorder %v1350_v8, 96 }
 0x105   :  { %910 = vmatpush.bf16.msk.msra.mxu2 %vm1758_vm6, %v1660_v1  ;;  %vm2237_vm6 = vcmp.lt.s32.totalorder %v1350_v8, 32  ;;  %v305_v60 = vsel %vm2239_vm7, %v1210_v31, %v1211_v51  ;;  %vm2240_vm15 = vmmov %vm2239_vm7 }
 0x106   :  { %v322_v1 = vsel %vm2237_vm6, %v1156_v11, %v1215_v61  ;;  %vm2238_vm12 = vmmov %vm2237_vm6  ;;  %v306_v35 = vsel %vm2240_vm15, %v1146_v24, %v1210_v31  ;;  %vm2245_vm15 = vcmp.lt.s32.totalorder %v1350_v8, 33 }
 0x107   :  { %v323_v62 = vsel %vm2238_vm12, %v1216_v10, %v1156_v11  ;;  %930 = vmatmul.msk.bf16.vlgmr.msra.gmra.mxu3 %vm550_vm8, %v1985_v42  ;;  %vm879_vm6 = vmneg %vm1795_vm1  ;;  %vm2243_vm12 = vcmp.lt.s32.totalorder %v1350_v8, 97  ;;  %v325_v59 = vsel %vm1582_vm11, %v305_v60, %v322_v1  ;;  %vm755_vm1 = vcmask 1041408  }
 0x108   :  { %911 = vmatmul.msk.bf16.vlgmr.msra.gmra.mxu2 %vm550_vm8, %v1985_v42  ;;  %v264_v43 = vsel %vm2243_vm12, %v1055_v14, %v2242_v3  ;;  %vm2244_vm7 = vmmov %vm2241_vm3  ;;  %v324_v15 = vsel %vm1582_vm11, %v306_v35, %v323_v62 }
 0x109   :  { %v1229_v45 = vpop.permute.xlu1 %1228  ;;  %v344_v28 = vsel %vm2244_vm7, %v1166_v20, %v1220_v56  ;;  %vm2246_vm3 = vmmov %vm2245_vm15 }
 0x10a   :  { %v1224_v33 = vpop.permute.xlu0 %1223  ;;  %v1231_v32 = vunpack.i.h.bf16 %v1229_v45  ;;  %v1230_v34 = vunpack.i.l.bf16 %v1229_v45  ;;  %vm861_vm12 = vmpackc.low %vm860_vm14, %vm2230_vm13  ;;  %537 = vperm.xlu2 %1232, %v519_v16  }
 0x10b   :  { %v1226_v2 = vunpack.i.h.bf16 %v1224_v33  ;;  %v1225_v4 = vunpack.i.l.bf16 %v1224_v33  ;;  %vm885_vm7 = vmpackc.low %vm1911_vm9, %vm879_vm6 }
 0x10c   :  { %v281_v12 = vsel %vm277_vm0, %v1231_v32, %v1206_v50  ;;  %v280_v22 = vsel %vm277_vm0, %v1206_v50, %v1230_v34  ;;  %vm880_vm0 = vmpackc.low %vm879_vm6, %vm2230_vm13 }
 0x10d   :  { %v360_v48 = vsel %vm2245_vm15, %v1176_v21, %v1225_v4  ;;  %v361_v27 = vsel %vm2246_vm3, %v1226_v2, %v1176_v21  ;;  %v282_v38 = vsel %vm1582_vm11, %v264_v43, %v281_v12  ;;  %v283_v57 = vsel %vm1582_vm11, %v1557_v58, %v280_v22  ;;  %vm866_vm13 = vmpackc.low %vm1890_vm10, %vm860_vm14  ;;  %v663_v58 = vld [vmem:[%s2171_s5 + $0x8] sm:$0xff] }
 0x10e   :  { %v362_v26 = vsel %vm1582_vm11, %v344_v28, %v361_v27  ;;  %v363_v8 = vsel %vm1582_vm11, %v343_v52, %v360_v48  ;;  %v867_v55 = vpack.c.bf16 %v282_v38, %v228_v9  ;;  %v886_v63 = vpack.c.bf16 %v283_v57, %v229_v46 }
 0x10f   :  { %v862_v7 = vpack.c.bf16 %v362_v26, %v324_v15  ;;  %v881_v29 = vpack.c.bf16 %v363_v8, %v325_v59  ;;  %vm749_vm11 = vcmask 1040384  }
 0x111   :  { %863 = vmatpush.bf16.msk.msra.mxu0 %vm861_vm12, %v862_v7  ;;  %882 = vmatpush.bf16.msk.msra.mxu1 %vm880_vm0, %v881_v29 }
 0x112   :  { %673 = vperm.xlu2 %1232, %v663_v58  }
 0x115   :  { %868 = vmatpush.bf16.msk.msra.mxu0 %vm866_vm13, %v867_v55  ;;  %887 = vmatpush.bf16.msk.msra.mxu1 %vm885_vm7, %v886_v63 }
 0x117   :  { %931 = vmatmul.msk.bf16.gmra.mxu3 %vm550_vm8, %v933_v6 }
 0x118   :  { %912 = vmatmul.msk.bf16.gmra.mxu2 %vm550_vm8, %v933_v6 }
 0x119   :  { %872 = vmatpush.bf16.msk.msra.mxu0 %vm1948_vm4, %v1704_v17  ;;  %891 = vmatpush.bf16.msk.msra.mxu1 %vm1967_vm5, %v1709_v47 }
 0x11c   :  { %873 = vmatmul.msk.bf16.vlgmr.msra.gmra.mxu0 %vm550_vm8, %v1985_v42  ;;  %892 = vmatmul.msk.bf16.vlgmr.msra.gmra.mxu1 %vm550_vm8, %v1985_v42 }
 0x12c   :  { %874 = vmatmul.msk.bf16.gmra.mxu0 %vm550_vm8, %v933_v6  ;;  %893 = vmatmul.msk.bf16.gmra.mxu1 %vm550_vm8, %v933_v6 }
 0x15c   :  { %v523_v30 = vpop.permute.xlu2 %522 }
 0x164   :  { %v2101_v9 = vpop.permute.xlu2 %537 }
 0x167   :  { %v533_v44 = vpop.permute.xlu1 %532 }
 0x168   :  { %v528_v53 = vpop.permute.xlu0 %527 }
 0x16c   :  { %v674_v18 = vpop.permute.xlu2 %673 }
 0x16f   :  { %v669_v5 = vpop.permute.xlu1 %668 }
 0x172   :  { %v679_v52 = vpop.permute.xlu0 %678 }
 0x18a   :  { %v636_v46 = vpop.f32.mrf.mxu3 }
 0x18b   :  { %v617_v23 = vpop.f32.mrf.mxu2  ;;  %v637_v47 = vadd.f32 %v636_v46, %v523_v30 }
 0x18c   :  { %v618_v17 = vadd.f32 %v617_v23, %v523_v30 }
 0x18d   :  { %v649_v36 = vmax.f32 %v637_v47, 0.0 }
 0x18e   :  { %v648_v40 = vmax.f32 %v618_v17, 0.0 }
 0x18f   :  { %v689_v10 = vmul.f32 %v669_v5, %v649_v36 }
 0x190   :  { %v792_v13 = vadd.f32 %v649_v36, %v648_v40  ;;  %v688_v42 = vmul.f32 %v669_v5, %v648_v40 }
 0x192   :  { %793 = vadd.xlane.f32.xlu0 %v792_v13  ;;  %v638_v25 = vpop.f32.mrf.mxu3 }
 0x193   :  { %v619_v54 = vpop.f32.mrf.mxu2  ;;  %v639_v39 = vadd.f32 %v638_v25, %v528_v53 }
 0x194   :  { %v620_v37 = vadd.f32 %v619_v54, %v528_v53 }
 0x195   :  { %v653_v61 = vmax.f32 %v639_v39, 0.0 }
 0x196   :  { %v652_v41 = vmax.f32 %v620_v37, 0.0 }
 0x197   :  { %v693_v49 = vmul.f32 %v674_v18, %v653_v61 }
 0x198   :  { %v692_v51 = vmul.f32 %v674_v18, %v652_v41  ;;  %v795_v23 = vadd.f32 %v653_v61, %v652_v41  ;;  %v665_v61 = vld [vmem:[%s2171_s5 + $0x18] sm:$0xff] }
 0x199   :  { %v579_v31 = vpop.f32.mrf.mxu0  ;;  %v598_v11 = vpop.f32.mrf.mxu1  ;;  %v729_v1 = vadd.f32 %v693_v49, %v689_v10 }
 0x19a   :  { %v580_v24 = vadd.f32 %v579_v31, %v523_v30  ;;  %v720_v14 = vadd.f32 %v692_v51, %v688_v42  ;;  %v599_v20 = vadd.f32 %v598_v11, %v523_v30  ;;  %v641_v35 = vpop.f32.mrf.mxu3 }
 0x19b   :  { %v622_v56 = vpop.f32.mrf.mxu2  ;;  %v642_v50 = vadd.f32 %v641_v35, %v533_v44 }
 0x19c   :  { %v646_v62 = vmax.f32 %v580_v24, 0.0  ;;  %v623_v60 = vadd.f32 %v622_v56, %v533_v44  ;;  %v647_v21 = vmax.f32 %v599_v20, 0.0  ;;  %v776_v20 = vld [vmem:[%s2169_s3 + $0x8] sm:$0xff] }
 0x19d   :  { %v657_v33 = vmax.f32 %v642_v50, 0.0 }
 0x19e   :  { %v656_v45 = vmax.f32 %v623_v60, 0.0  ;;  %v759_v32 = vadd.f32 %v647_v21, %v646_v62  ;;  %v686_v48 = vmul.f32 %v669_v5, %v646_v62  ;;  %v687_v0 = vmul.f32 %v669_v5, %v647_v21  ;;  %v775_v60 = vld [vmem:[%s2169_s3] sm:$0xff]  ;;  %v777_v21 = vld [vmem:[%s2169_s3 + $0x10] sm:$0xff] }
 0x19f   :  { %v697_v4 = vmul.f32 %v679_v52, %v657_v33 }
 0x1a0   :  { %v696_v34 = vmul.f32 %v679_v52, %v656_v45  ;;  %760 = vadd.xlane.f32.xlu1 %v759_v32  ;;  %v798_v42 = vadd.f32 %v657_v33, %v656_v45 }
 0x1a1   :  { %v581_v2 = vpop.f32.mrf.mxu0  ;;  %v600_v43 = vpop.f32.mrf.mxu1  ;;  %v2105_v59 = vadd.f32 %v729_v1, %v697_v4 }
 0x1a2   :  { %v582_v3 = vadd.f32 %v581_v2, %v528_v53  ;;  %v2103_v28 = vadd.f32 %v720_v14, %v696_v34  ;;  %v601_v15 = vadd.f32 %v600_v43, %v528_v53  ;;  %v643_v6 = vpop.f32.mrf.mxu3 }
 0x1a3   :  { %v624_v63 = vpop.f32.mrf.mxu2  ;;  %v2111_v17 = vadd.f32 %v643_v6, %v2101_v9 }
 0x1a4   :  { %v650_v12 = vmax.f32 %v582_v3, 0.0  ;;  %v651_v22 = vmax.f32 %v601_v15, 0.0  ;;  %v2108_v46 = vadd.f32 %v624_v63, %v2101_v9  ;;  %v778_v3 = vld [vmem:[%s2169_s3 + $0x18] sm:$0xff] }
 0x1a5   :  { %v661_v37 = vmax.f32 %v2111_v17, 0.0 }
 0x1a6   :  { %v690_v27 = vmul.f32 %v674_v18, %v650_v12  ;;  %v691_v19 = vmul.f32 %v674_v18, %v651_v22  ;;  %v762_v26 = vadd.f32 %v651_v22, %v650_v12  ;;  %v660_v25 = vmax.f32 %v2108_v46, 0.0 }
 0x1a8   :  { %v702_v8 = vadd.f32 %v690_v27, %v686_v48  ;;  %v711_v38 = vadd.f32 %v691_v19, %v687_v0  ;;  %763 = vadd.xlane.f32.xlu2 %v762_v26  ;;  %v801_v41 = vadd.f32 %v661_v37, %v660_v25 }
 0x1a9   :  { %v584_v57 = vpop.f32.mrf.mxu0  ;;  %v603_v29 = vpop.f32.mrf.mxu1 }
 0x1aa   :  { %v585_v7 = vadd.f32 %v584_v57, %v533_v44  ;;  %v604_v55 = vadd.f32 %v603_v29, %v533_v44 }
 0x1ac   :  { %v654_v16 = vmax.f32 %v585_v7, 0.0  ;;  %v655_v58 = vmax.f32 %v604_v55, 0.0 }
 0x1ae   :  { %v694_v30 = vmul.f32 %v679_v52, %v654_v16  ;;  %v695_v47 = vmul.f32 %v679_v52, %v655_v58  ;;  %v765_v40 = vadd.f32 %v655_v58, %v654_v16 }
 0x1b0   :  { %v2113_v36 = vadd.f32 %v702_v8, %v694_v30  ;;  %v2115_v13 = vadd.f32 %v711_v38, %v695_v47  ;;  %766 = vadd.xlane.f32.xlu0 %v765_v40  ;;  %796 = vadd.xlane.f32.xlu2 %v795_v23 }
 0x1b1   :  { %v586_v44 = vpop.f32.mrf.mxu0  ;;  %v605_v53 = vpop.f32.mrf.mxu1 }
 0x1b2   :  { %v2118_v54 = vadd.f32 %v586_v44, %v2101_v9  ;;  %v2123_v5 = vadd.f32 %v605_v53, %v2101_v9  ;;  %v738_v9 = vld [vmem:[#allocation2] sm:$0x1] }
 0x1b3   :  { %v1235_v53 = vld [vmem:[%s2170_s4] ss:$0 sm:$0xff] }
 0x1b4   :  { %v658_v18 = vmax.f32 %v2118_v54, 0.0  ;;  %v659_v39 = vmax.f32 %v2123_v5, 0.0 }
 0x1b6   :  { %v768_v10 = vadd.f32 %v659_v39, %v658_v18 }
 0x1b8   :  { %799 = vadd.xlane.f32.xlu0 %v798_v42  ;;  %802 = vadd.xlane.f32.xlu2 %v801_v41 }
 0x1b9   :  { %769 = vadd.xlane.f32.xlu1 %v768_v10 }
 0x1cc   :  { %683 = vperm.xlu0 %1233, %v665_v61  }
 0x1d4   :  { %741 = vperm.xlu0 %1233, %v738_v9  }
 0x205   :  { %v794_v51 = vpop.xlane.xlu0 %793 }
 0x206   :  { %v804_v35 = vmul.f32 0.00390625, %v794_v51 }
 0x208   :  { %v808_v2 = vmul.f32 %v804_v35, %v775_v60 }
 0x213   :  { %v761_v11 = vpop.xlane.xlu1 %760 }
 0x214   :  { %v771_v1 = vmul.f32 0.00390625, %v761_v11 }
 0x216   :  { %v779_v45 = vmul.f32 %v775_v60, %v771_v1 }
 0x21b   :  { %v764_v31 = vpop.xlane.xlu2 %763 }
 0x21c   :  { %v772_v14 = vmul.f32 0.00390625, %v764_v31 }
 0x21e   :  { %v780_v50 = vmul.f32 %v776_v20, %v772_v14 }
 0x220   :  { %v783_v12 = vadd.f32 %v780_v50, %v779_v45 }
 0x223   :  { %v767_v49 = vpop.xlane.xlu0 %766  ;;  %v797_v24 = vpop.xlane.xlu2 %796 }
 0x224   :  { %v805_v56 = vmul.f32 0.00390625, %v797_v24  ;;  %v773_v62 = vmul.f32 0.00390625, %v767_v49 }
 0x226   :  { %v809_v52 = vmul.f32 %v805_v56, %v776_v20  ;;  %v781_v33 = vmul.f32 %v777_v21, %v773_v62 }
 0x228   :  { %v812_v48 = vadd.f32 %v809_v52, %v808_v2  ;;  %v784_v0 = vadd.f32 %v783_v12, %v781_v33 }
 0x22b   :  { %v800_v32 = vpop.xlane.xlu0 %799  ;;  %v803_v34 = vpop.xlane.xlu2 %802 }
 0x22c   :  { %v806_v4 = vmul.f32 0.00390625, %v800_v32  ;;  %v807_v43 = vmul.f32 0.00390625, %v803_v34  ;;  %v770_v15 = vpop.xlane.xlu1 %769 }
 0x22d   :  { %v774_v22 = vmul.f32 0.00390625, %v770_v15 }
 0x22e   :  { %v810_v27 = vmul.f32 %v806_v4, %v777_v21  ;;  %v811_v8 = vmul.f32 %v807_v43, %v778_v3 }
 0x22f   :  { %v782_v19 = vmul.f32 %v778_v3, %v774_v22 }
 0x230   :  { %v813_v26 = vadd.f32 %v812_v48, %v810_v27 }
 0x231   :  { %v785_v38 = vadd.f32 %v784_v0, %v782_v19 }
 0x232   :  { %v814_v57 = vadd.f32 %v813_v26, %v811_v8 }
 0x233   :  { %v786_v7 = vrot.slane %v785_v38, 4 }
 0x234   :  { %v815_v29 = vrot.slane %v814_v57, 4 }
 0x235   :  { %v787_v55 = vadd.f32 %v786_v7, %v785_v38 }
 0x236   :  { %v816_v63 = vadd.f32 %v815_v29, %v814_v57 }
 0x237   :  { %v788_v6 = vrot.slane %v787_v55, 2 }
 0x238   :  { %v817_v16 = vrot.slane %v816_v63, 2 }
 0x239   :  { %v789_v58 = vadd.f32 %v788_v6, %v787_v55 }
 0x23a   :  { %v818_v30 = vadd.f32 %v817_v16, %v816_v63 }
 0x23b   :  { %v790_v23 = vrot.slane %v789_v58, 1 }
 0x23c   :  { %v819_v47 = vrot.slane %v818_v30, 1 }
 0x23d   :  { %v791_v44 = vadd.f32 %v790_v23, %v789_v58 }
 0x23e   :  { %v684_v40 = vpop.permute.xlu0 %683  ;;  %v820_v54 = vadd.f32 %v819_v47, %v818_v30 }
 0x23f   :  { %v698_v5 = vmul.f32 %v684_v40, %v658_v18  ;;  %v699_v42 = vmul.f32 %v684_v40, %v659_v39  ;;  %v700_v41 = vmul.f32 %v684_v40, %v660_v25  ;;  %v701_v10 = vmul.f32 %v684_v40, %v661_v37 }
 0x240   :  { %v821_v61 = vsel %vm749_vm11, %v791_v44, %v820_v54 }
 0x241   :  { %v704_v9 = vadd.f32 %v2113_v36, %v698_v5  ;;  %v713_v51 = vadd.f32 %v2115_v13, %v699_v42  ;;  %v722_v18 = vadd.f32 %v2103_v28, %v700_v41  ;;  %v731_v46 = vadd.f32 %v2105_v59, %v701_v10 }
 0x242   :  { %v826_v25 = vadd.f32 %v1235_v53, %v821_v61 }
 0x243   :  { %v705_v17 = vrot.slane %v704_v9, 4  ;;  %v714_v37 = vrot.slane %v713_v51, 4  ;;  %v723_v39 = vrot.slane %v722_v18, 4  ;;  %v732_v31 = vrot.slane %v731_v46, 4 }
 0x244   :  { %827 = vst [vmem:[#allocation3] sm:$0x3] %v826_v25 }
 0x245   :  { %v706_v49 = vadd.f32 %v705_v17, %v704_v9  ;;  %v715_v24 = vadd.f32 %v714_v37, %v713_v51  ;;  %v724_v11 = vadd.f32 %v723_v39, %v722_v18  ;;  %v733_v14 = vadd.f32 %v732_v31, %v731_v46  ;;  %838 = dma.vmem_to_hbm [thread:$0]  %s834_s17, 32, %s836_s20, [#allocation4]  }
 0x246   :  { %v742_v62 = vpop.permute.xlu0 %741 }
 0x247   :  { %v707_v36 = vrot.slane %v706_v49, 2  ;;  %v716_v20 = vrot.slane %v715_v24, 2  ;;  %v725_v13 = vrot.slane %v724_v11, 2  ;;  %v734_v56 = vrot.slane %v733_v14, 2 }
 0x248   :  { %v744_v45 = vperm.slane %v742_v62, 0 }
 0x249   :  { %v717_v28 = vadd.f32 %v716_v20, %v715_v24  ;;  %v726_v1 = vadd.f32 %v725_v13, %v724_v11  ;;  %v735_v59 = vadd.f32 %v734_v56, %v733_v14  ;;  %v708_v60 = vadd.f32 %v707_v36, %v706_v49 }
 0x24b   :  { %v718_v35 = vrot.slane %v717_v28, 1  ;;  %v727_v21 = vrot.slane %v726_v1, 1  ;;  %v736_v50 = vrot.slane %v735_v59, 1  ;;  %v709_v52 = vrot.slane %v708_v60, 1 }
 0x24d   :  { %v719_v33 = vadd.f32 %v718_v35, %v717_v28  ;;  %v728_v32 = vadd.f32 %v727_v21, %v726_v1  ;;  %v737_v34 = vadd.f32 %v736_v50, %v735_v59  ;;  %v710_v2 = vadd.f32 %v709_v52, %v708_v60 }
 0x24f   :  { %v745_v4 = vadd.f32 %v744_v45, %v710_v2  ;;  %v746_v3 = vadd.f32 %v744_v45, %v719_v33  ;;  %v747_v43 = vadd.f32 %v744_v45, %v728_v32  ;;  %v748_v15 = vadd.f32 %v744_v45, %v737_v34 }
 0x251   :  { %v750_v12 = vsel %vm749_vm11, %v745_v4, %v747_v43  ;;  %v751_v22 = vsel %vm749_vm11, %v746_v3, %v748_v15 }
 0x252   :  { %v754_v48 = vrot.slane %v751_v22, 6 }
 0x254   :  { %v756_v27 = vsel %vm755_vm1, %v750_v12, %v754_v48 }
 0x255   :  { %758 = vst [vmem:[%s2174_s8] sm:$0xf] %v756_v27 }
 0x256   :  { %1260 = dma.done.wait [#allocation4], 32  }
 0x257   :  { %1261 = vsyncadd [#allocation4], 4294967264 }
 0x258   :  { %847 = vsyncpa [#allocation4], 1 }

</bundles_post_ra>
